<compile_context>
chip_gen: v7x
topology: tpu7x:2x2x1
jax: 0.10.0
libtpu: 0.0.40
codegen_flags: <defaults>
</compile_context>

<pallas_src>
import functools

import numpy as np
import jax
import jax.numpy as jnp
from jax import lax
from jax.experimental import pallas as pl
from jax.experimental.pallas import tpu as pltpu

_LN_EPS = 1e-5

_VMEM_LIMIT_CACHE = None


def _vmem_limit_bytes():
    """Generation-aware VMEM budget: ~75% of physical capacity, clamped.
    v5e/v6e (128 MiB) -> 96 MiB, v7x (64 MiB) -> 48 MiB, fallback 32 MiB."""
    global _VMEM_LIMIT_CACHE
    if _VMEM_LIMIT_CACHE is None:
        limit = 32 * 1024 * 1024
        try:
            cap = getattr(pltpu.get_tpu_info(), "vmem_capacity_bytes", None)
            if cap:
                limit = int(min(max(cap * 3 // 4, 32 * 1024 * 1024),
                                100 * 1024 * 1024))
        except Exception:
            pass
        _VMEM_LIMIT_CACHE = limit
    return _VMEM_LIMIT_CACHE


def _row_tile(extent, preferred):
    """Row (sublane) tile + padded extent.

    If the extent fits one preferred tile, use the full extent (always a legal
    block dim).  Otherwise use `preferred` (a multiple of 8) and pad the array
    up to a multiple of it — no full-extent fallback for huge lengths."""
    if extent <= preferred:
        return extent, extent
    pad = -(-extent // preferred) * preferred
    return preferred, pad


def _divisor_tile(extent, preferred):
    """Largest 128-multiple tile <= preferred that divides `extent`, else full."""
    if extent <= preferred:
        return extent
    for t in (preferred, 512, 256, 128):
        if t <= preferred and extent % t == 0:
            return t
    # TODO(synk): pad the weight inner dim for awkward sizes instead of holding
    # it whole in VMEM.
    return extent


def _pad_rows(a, rows):
    if a.shape[0] == rows:
        return a
    return jnp.pad(a, ((0, rows - a.shape[0]), (0, 0)))


def _mm(a, b, mm_dtype):
    """Wrapper-side matmul: bf16 operands / f32 accumulation on the perf path,
    exact f32 on the validation path (no global matmul-precision flag)."""
    if mm_dtype == jnp.float32:
        return jnp.dot(a, b, precision=lax.Precision.HIGHEST)
    return jnp.dot(a.astype(mm_dtype), b.astype(mm_dtype),
                   preferred_element_type=jnp.float32)


# ---------------------------------------------------------------------------
# Kernel 1: masked multi-head attention core (flash-style reduction over Lk)
#   softmax is the module's "StableSoftMax":  exp(x) / (sum(exp(x)) + 1e-10)
#   (no max subtraction — matches the PyTorch reference), key-padding mask is
#   applied as jnp.where(keep, exp(s), 0)  ==  exp(-inf) == 0.
# ---------------------------------------------------------------------------
def _attention_kernel(qrow_ref, krow_ref, keep_ref, o_ref, num_acc, den_acc,
                      *, H, Dk, Dv, inv_temperature, mm_dtype):
    ki = pl.program_id(2)

    @pl.when(ki == 0)
    def _init():
        num_acc[...] = jnp.zeros_like(num_acc)
        den_acc[...] = jnp.zeros_like(den_acc)

    keep = keep_ref[...]                        # (1, tk): 1 = valid key, 0 = pad
    dqk = H * Dk
    for h in range(H):                          # H is small and static
        # 1/temperature folded into the small (tq, Dk) q slice, not the scores.
        q_h = qrow_ref[:, h * Dk:(h + 1) * Dk] * inv_temperature
        k_h = krow_ref[:, dqk + h * Dk: dqk + (h + 1) * Dk]
        s = lax.dot_general(q_h.astype(mm_dtype), k_h.astype(mm_dtype),
                            dimension_numbers=(((1,), (1,)), ((), ())),
                            preferred_element_type=jnp.float32)     # (tq, tk)
        # Mask BEFORE any multiply so exp-overflow at padded keys cannot produce
        # inf*0 = NaN; exp itself stays f32 (StableSoftMax has no max-subtract).
        ex = jnp.where(keep > 0.0, jnp.exp(s), 0.0)
        den_acc[h] += jnp.sum(ex, axis=-1, keepdims=True)
        v_h = krow_ref[:, 2 * dqk + h * Dv: 2 * dqk + (h + 1) * Dv]
        num_acc[h] += jnp.dot(ex.astype(mm_dtype), v_h.astype(mm_dtype),
                              preferred_element_type=jnp.float32)

    @pl.when(ki == pl.num_programs(2) - 1)
    def _finalize():
        heads = []
        for h in range(H):
            # approx reciprocal (EUP slot); tiny numerics deviation vs exact div.
            inv = pl.reciprocal(den_acc[h] + 1e-10, approx=True)
            heads.append(num_acc[h] * inv)
        # Single wide (tq, H*Dv) store straight into the (B, L, H*Dv) slab.
        o_ref[...] = jnp.concatenate(heads, axis=-1).astype(o_ref.dtype)


def masked_attention(qkv, key_keep, *, H, Dk, Dv, temperature, mm_dtype,
                     block_l=512):
    """qkv: (B, L, H*(2Dk+Dv)) fused projections laid out [q | k | v];
    key_keep: (B, 1, L) float (1 = valid key, 0 = pad).
    Returns (B, L, H*Dv) context, head-major per token (layout consumed by the
    output projection) — no transposes before or after the call."""
    B, L, W = qkv.shape
    dqk, dv_all = H * Dk, H * Dv
    assert W == 2 * dqk + dv_all
    t, Lp = _row_tile(L, block_l)
    if Lp != L:
        qkv = jnp.pad(qkv, ((0, 0), (0, Lp - L), (0, 0)))
        key_keep = jnp.pad(key_keep, ((0, 0), (0, 0), (0, Lp - L)))  # pads masked
    n = Lp // t

    kernel = functools.partial(_attention_kernel, H=H, Dk=Dk, Dv=Dv,
                               inv_temperature=1.0 / float(temperature),
                               mm_dtype=mm_dtype)
    cost = pl.CostEstimate(
        flops=2 * B * H * Lp * Lp * (Dk + Dv),
        transcendentals=B * H * Lp * Lp,
        bytes_accessed=4 * (B * Lp * W * (1 + n) + B * Lp + B * Lp * dv_all),
    )
    out = pl.pallas_call(
        kernel,
        out_shape=jax.ShapeDtypeStruct((B, Lp, dv_all), qkv.dtype),
        grid_spec=pltpu.PrefetchScalarGridSpec(
            num_scalar_prefetch=0,
            grid=(B, n, n),
            in_specs=[
                # The fused qkv slab is passed twice: row-blocked by the q tile
                # (constant across the k axis -> fetched once per q tile) and by
                # the k tile.  Last block dim is the full width -> legal blocks.
                pl.BlockSpec((None, t, W), lambda b, qi, ki: (b, qi, 0)),
                pl.BlockSpec((None, t, W), lambda b, qi, ki: (b, ki, 0)),
                pl.BlockSpec((None, 1, t), lambda b, qi, ki: (b, 0, ki)),
            ],
            out_specs=pl.BlockSpec((None, t, dv_all),
                                   lambda b, qi, ki: (b, qi, 0)),
            scratch_shapes=[
                pltpu.VMEM((H, t, Dv), jnp.float32),   # per-head numerators
                pltpu.VMEM((H, t, 1), jnp.float32),    # per-head denominators
            ],
        ),
        compiler_params=pltpu.CompilerParams(
            dimension_semantics=("parallel", "parallel", "arbitrary"),
            vmem_limit_bytes=_vmem_limit_bytes(),
        ),
        cost_estimate=cost,
    )(qkv, qkv, key_keep)
    return out if Lp == L else out[:, :L]


# ---------------------------------------------------------------------------
# Kernel 2: fused  y = non_pad * LayerNorm(ctx @ W + b + residual)
#           (MultiHeadAttention tail: fc -> dropout(id) -> +residual -> LN -> mask)
# ---------------------------------------------------------------------------
def _proj_residual_ln_kernel(x_ref, w_ref, b_ref, res_ref, g_ref, beta_ref,
                             m_ref, o_ref, *, eps, mm_dtype):
    y = jnp.dot(x_ref[...].astype(mm_dtype), w_ref[...].astype(mm_dtype),
                preferred_element_type=jnp.float32)
    y = y + b_ref[...] + res_ref[...].astype(jnp.float32)
    mean = jnp.mean(y, axis=-1, keepdims=True)
    c = y - mean
    var = jnp.mean(c * c, axis=-1, keepdims=True)
    y = c * lax.rsqrt(var + eps) * g_ref[...] + beta_ref[...]
    o_ref[...] = (y * m_ref[...]).astype(o_ref.dtype)


def fused_proj_residual_ln(x, w, b, residual, gamma, beta, mask, *, mm_dtype,
                           block_rows=512):
    R, Din = x.shape
    Dout = w.shape[1]
    tr, Rp = _row_tile(R, block_rows)
    x, residual, mask = (_pad_rows(a, Rp) for a in (x, residual, mask))
    kernel = functools.partial(_proj_residual_ln_kernel, eps=_LN_EPS,
                               mm_dtype=mm_dtype)
    out = pl.pallas_call(
        kernel,
        out_shape=jax.ShapeDtypeStruct((Rp, Dout), x.dtype),
        grid_spec=pltpu.PrefetchScalarGridSpec(
            num_scalar_prefetch=0,
            grid=(Rp // tr,),
            in_specs=[
                pl.BlockSpec((tr, Din), lambda r: (r, 0)),
                pl.BlockSpec((Din, Dout), lambda r: (0, 0)),
                pl.BlockSpec((1, Dout), lambda r: (0, 0)),
                pl.BlockSpec((tr, Dout), lambda r: (r, 0)),
                pl.BlockSpec((1, Dout), lambda r: (0, 0)),
                pl.BlockSpec((1, Dout), lambda r: (0, 0)),
                pl.BlockSpec((tr, 1), lambda r: (r, 0)),
            ],
            out_specs=pl.BlockSpec((tr, Dout), lambda r: (r, 0)),
        ),
        compiler_params=pltpu.CompilerParams(
            dimension_semantics=("parallel",),
            vmem_limit_bytes=_vmem_limit_bytes(),
        ),
    )(x, w, b.reshape(1, Dout), residual, gamma.reshape(1, Dout),
      beta.reshape(1, Dout), mask)
    return out if Rp == R else out[:R]


# ---------------------------------------------------------------------------
# Kernel 3: fused position-wise FFN, inner dim tiled as a reduction axis:
#           y = non_pad * LayerNorm(relu(x @ W1 + b1) @ W2 + b2 + x)
# ---------------------------------------------------------------------------
def _ffn_residual_ln_kernel(x_ref, w1_ref, b1_ref, w2_ref, b2_ref, g_ref,
                            beta_ref, m_ref, o_ref, acc_ref, *, eps, mm_dtype):
    ji = pl.program_id(1)

    @pl.when(ji == 0)
    def _init():
        acc_ref[...] = jnp.zeros_like(acc_ref)

    x = x_ref[...]
    h = jnp.dot(x.astype(mm_dtype), w1_ref[...].astype(mm_dtype),
                preferred_element_type=jnp.float32) + b1_ref[...]
    h = jnp.maximum(h, 0.0)
    acc_ref[...] += jnp.dot(h.astype(mm_dtype), w2_ref[...].astype(mm_dtype),
                            preferred_element_type=jnp.float32)

    @pl.when(ji == pl.num_programs(1) - 1)
    def _finalize():
        y = acc_ref[...] + b2_ref[...] + x.astype(jnp.float32)
        mean = jnp.mean(y, axis=-1, keepdims=True)
        c = y - mean
        var = jnp.mean(c * c, axis=-1, keepdims=True)
        y = c * lax.rsqrt(var + eps) * g_ref[...] + beta_ref[...]
        o_ref[...] = (y * m_ref[...]).astype(o_ref.dtype)


def fused_ffn_residual_ln(x, w1, b1, w2, b2, gamma, beta, mask, *, mm_dtype,
                          block_rows=512, block_inner=512):
    R, E = x.shape
    inner = w1.shape[1]
    tr, Rp = _row_tile(R, block_rows)
    ti = _divisor_tile(inner, block_inner)
    x, mask = (_pad_rows(a, Rp) for a in (x, mask))
    kernel = functools.partial(_ffn_residual_ln_kernel, eps=_LN_EPS,
                               mm_dtype=mm_dtype)
    out = pl.pallas_call(
        kernel,
        out_shape=jax.ShapeDtypeStruct((Rp, E), x.dtype),
        grid_spec=pltpu.PrefetchScalarGridSpec(
            num_scalar_prefetch=0,
            grid=(Rp // tr, inner // ti),
            in_specs=[
                pl.BlockSpec((tr, E), lambda r, j: (r, 0)),   # constant over j
                pl.BlockSpec((E, ti), lambda r, j: (0, j)),   # W1 column block
                pl.BlockSpec((1, ti), lambda r, j: (0, j)),
                pl.BlockSpec((ti, E), lambda r, j: (j, 0)),   # W2 row block
                pl.BlockSpec((1, E), lambda r, j: (0, 0)),
                pl.BlockSpec((1, E), lambda r, j: (0, 0)),
                pl.BlockSpec((1, E), lambda r, j: (0, 0)),
                pl.BlockSpec((tr, 1), lambda r, j: (r, 0)),
            ],
            out_specs=pl.BlockSpec((tr, E), lambda r, j: (r, 0)),
            scratch_shapes=[pltpu.VMEM((tr, E), jnp.float32)],
        ),
        compiler_params=pltpu.CompilerParams(
            dimension_semantics=("parallel", "arbitrary"),
            vmem_limit_bytes=_vmem_limit_bytes(),
        ),
    )(x, w1, b1.reshape(1, inner), w2, b2.reshape(1, E),
      gamma.reshape(1, E), beta.reshape(1, E), mask)
    return out if Rp == R else out[:R]


# ---------------------------------------------------------------------------
# Encoder built from the Pallas kernels (eval mode)
# ---------------------------------------------------------------------------
def _encoder_unit_layer(p, x, key_keep, non_pad2d, H, Dk, Dv, mm_dtype):
    B, L, E = x.shape
    x2d = x.reshape(B * L, E)
    # Single fused QKV projection: x read once, full-width N for the MXU.
    qkv = (_mm(x2d, p["wqkv"], mm_dtype) + p["bqkv"]).reshape(B, L, -1)
    ctx = masked_attention(qkv, key_keep, H=H, Dk=Dk, Dv=Dv,
                           temperature=float(Dk) ** 0.5, mm_dtype=mm_dtype)
    x1 = fused_proj_residual_ln(ctx.reshape(B * L, H * Dv), p["fc_w"], p["fc_b"],
                                x2d, p["ln1_g"], p["ln1_b"], non_pad2d,
                                mm_dtype=mm_dtype)
    x2 = fused_ffn_residual_ln(x1, p["w1"], p["b1"], p["w2"], p["b2"],
                               p["ln2_g"], p["ln2_b"], non_pad2d,
                               mm_dtype=mm_dtype)
    return x2.reshape(B, L, E)


def transformer_encoder_forward(params, src_seq, src_pos, *, H, Dk, Dv,
                                mm_dtype=jnp.bfloat16):
    B, L = src_seq.shape
    x = jnp.take(params["embedding"], src_seq, axis=0) + \
        jnp.take(params["pos_table"], src_pos, axis=0)            # (B, L, E)
    keep = (src_seq != 0)
    non_pad2d = keep.astype(x.dtype).reshape(B * L, 1)
    key_keep = keep.astype(jnp.float32).reshape(B, 1, L)

    for p in params["layers"]:
        x = _encoder_unit_layer(p, x, key_keep, non_pad2d, H, Dk, Dv, mm_dtype)

    pool_avg = jnp.mean(x, axis=1)
    pool_max = jnp.max(x, axis=1)
    xf = jnp.concatenate([pool_avg, pool_max], axis=1)
    xf = jnp.maximum(_mm(xf, params["head_w"], mm_dtype) + params["head_b"], 0.0)
    return _mm(xf, params["out_w"], mm_dtype) + params["out_b"]


# ---------------------------------------------------------------------------
# Pure-JAX f32 reference (same math, no Pallas) for validation
# ---------------------------------------------------------------------------
def _ref_layer_norm(x, g, b):
    mean = jnp.mean(x, axis=-1, keepdims=True)
    c = x - mean
    var = jnp.mean(c * c, axis=-1, keepdims=True)
    return c / jnp.sqrt(var + _LN_EPS) * g + b


def reference_forward(params, src_seq, src_pos, H, Dk, Dv):
    hi = lax.Precision.HIGHEST
    B, L = src_seq.shape
    x = jnp.take(params["embedding"], src_seq, axis=0) + \
        jnp.take(params["pos_table"], src_pos, axis=0)
    pad = (src_seq == 0)
    non_pad = (~pad).astype(x.dtype)[..., None]

    for p in params["layers"]:
        dqk = H * Dk
        qkv = jnp.dot(x, p["wqkv"], precision=hi) + p["bqkv"]
        q = qkv[..., :dqk].reshape(B, L, H, Dk)
        k = qkv[..., dqk:2 * dqk].reshape(B, L, H, Dk)
        v = qkv[..., 2 * dqk:].reshape(B, L, H, Dv)
        scores = jnp.einsum("bqhd,bkhd->bhqk", q, k, precision=hi) / \
            (float(Dk) ** 0.5)
        scores = jnp.where(pad[:, None, None, :], -jnp.inf, scores)
        ex = jnp.exp(scores)
        attn = ex / (jnp.sum(ex, axis=-1, keepdims=True) + 1e-10)
        ctx = jnp.einsum("bhqk,bkhd->bqhd", attn, v,
                         precision=hi).reshape(B, L, H * Dv)
        y = _ref_layer_norm(jnp.dot(ctx, p["fc_w"], precision=hi) + p["fc_b"] + x,
                            p["ln1_g"], p["ln1_b"]) * non_pad
        h = jnp.maximum(jnp.dot(y, p["w1"], precision=hi) + p["b1"], 0.0)
        x = _ref_layer_norm(jnp.dot(h, p["w2"], precision=hi) + p["b2"] + y,
                            p["ln2_g"], p["ln2_b"]) * non_pad

    pool_avg = jnp.mean(x, axis=1)
    pool_max = jnp.max(x, axis=1)
    xf = jnp.concatenate([pool_avg, pool_max], axis=1)
    xf = jnp.maximum(jnp.dot(xf, params["head_w"], precision=hi) +
                     params["head_b"], 0.0)
    return jnp.dot(xf, params["out_w"], precision=hi) + params["out_b"]


# ---------------------------------------------------------------------------
# Parameter construction (weights stored pre-transposed (in, out) and QKV
# fused/concatenated ONCE — when porting a PyTorch checkpoint, transpose the
# nn.Linear weights once at load time).
# ---------------------------------------------------------------------------
def get_sinusoid_encoding_table(n_position, hidden_dim, padding_idx=None):
    def cal_angle(position, hid_idx):
        return position / np.power(10000, 2 * (hid_idx // 2) / hidden_dim)
    table = np.array([[cal_angle(pos, j) for j in range(hidden_dim)]
                      for pos in range(n_position)])
    table[:, 0::2] = np.sin(table[:, 0::2])
    table[:, 1::2] = np.cos(table[:, 1::2])
    if padding_idx is not None:
        table[padding_idx] = 0.0
    return jnp.asarray(table, dtype=jnp.float32)


def _init_layer(key, E, H, Dk, Dv, inner, scale=0.1):
    ks = jax.random.split(key, 6)
    f32 = jnp.float32
    wq = jax.random.normal(ks[0], (E, H * Dk), f32) * scale
    wk = jax.random.normal(ks[1], (E, H * Dk), f32) * scale
    wv = jax.random.normal(ks[2], (E, H * Dv), f32) * scale
    return dict(
        wqkv=jnp.concatenate([wq, wk, wv], axis=1),          # (E, H*(2Dk+Dv))
        bqkv=jnp.zeros((H * (2 * Dk + Dv),), f32),
        fc_w=jax.random.normal(ks[3], (H * Dv, E), f32) * scale,
        fc_b=jnp.zeros((E,), f32),
        ln1_g=jnp.ones((E,), f32), ln1_b=jnp.zeros((E,), f32),
        w1=jax.random.normal(ks[4], (E, inner), f32) * scale,
        b1=jnp.zeros((inner,), f32),
        w2=jax.random.normal(ks[5], (inner, E), f32) * scale,
        b2=jnp.zeros((E,), f32),
        ln2_g=jnp.ones((E,), f32), ln2_b=jnp.zeros((E,), f32),
    )


if __name__ == "__main__":
    # Small shapes consistent with the module.
    B, L = 2, 8                # batch, seq_length
    vocab, E = 12, 32          # vocabulary, embed_dim
    H, Dk, Dv = 4, 8, 8        # num_head, k_dim, v_dim
    inner = 64                 # inner_dim
    num_layers = 2
    out_hidden = 16

    key = jax.random.PRNGKey(0)
    k_emb, k_head, k_out, *k_layers = jax.random.split(key, 3 + num_layers)

    emb = jax.random.normal(k_emb, (vocab, E), jnp.float32)
    emb = emb.at[0].set(0.0)   # pad token embedding

    params = dict(
        embedding=emb,
        pos_table=get_sinusoid_encoding_table(L + 1, E, padding_idx=0),
        layers=[_init_layer(k_layers[i], E, H, Dk, Dv, inner)
                for i in range(num_layers)],
        head_w=jax.random.normal(k_head, (2 * E, out_hidden), jnp.float32) * 0.1,
        head_b=jnp.zeros((out_hidden,), jnp.float32),
        out_w=jax.random.normal(k_out, (out_hidden, 1), jnp.float32) * 0.1,
        out_b=jnp.zeros((1,), jnp.float32),
    )

    # Deterministic token sequences with trailing padding (token 0).
    src_seq = jnp.array([[3, 7, 2, 9, 5, 0, 0, 0],
                         [4, 1, 8, 6, 2, 7, 3, 0]], dtype=jnp.int32)
    src_pos = jnp.where(src_seq != 0,
                        jnp.arange(1, L + 1, dtype=jnp.int32)[None, :], 0)

    ref = jax.block_until_ready(
        reference_forward(params, src_seq, src_pos, H, Dk, Dv))

    # Validation path: f32 MXU operands, compared strictly against the reference.
    fwd_f32 = jax.jit(functools.partial(transformer_encoder_forward,
                                        H=H, Dk=Dk, Dv=Dv,
                                        mm_dtype=jnp.float32))
    out_f32 = jax.block_until_ready(fwd_f32(params, src_seq, src_pos))
    assert out_f32.shape == (B, 1), out_f32.shape
    assert bool(jnp.all(jnp.isfinite(out_f32))), "non-finite output (f32 path)"
    assert jnp.allclose(out_f32, ref, atol=1e-2, rtol=1e-2), (
        "f32 mismatch", np.asarray(out_f32), np.asarray(ref))

    # Perf path: bf16 MXU operands / f32 accumulation (v6e/v7x native).
    fwd_bf16 = jax.jit(functools.partial(transformer_encoder_forward,
                                         H=H, Dk=Dk, Dv=Dv,
                                         mm_dtype=jnp.bfloat16))
    out_bf16 = jax.block_until_ready(fwd_bf16(params, src_seq, src_pos))
    assert bool(jnp.all(jnp.isfinite(out_bf16))), "non-finite output (bf16 path)"
    assert jnp.allclose(out_bf16, ref, atol=5e-2, rtol=5e-2), (
        "bf16 mismatch", np.asarray(out_bf16), np.asarray(ref))

    print("KERNEL_OK")
</pallas_src>

<mosaic_0001>
module attributes {stable_mosaic.version = 11 : i64} {
  func.func @_proj_residual_ln_kernel(%arg0: i32, %arg1: memref<16x32xf32, #tpu.memory_space<vmem>>, %arg2: memref<32x32xf32, #tpu.memory_space<vmem>>, %arg3: memref<1x32xf32, #tpu.memory_space<vmem>>, %arg4: memref<16x32xf32, #tpu.memory_space<vmem>>, %arg5: memref<1x32xf32, #tpu.memory_space<vmem>>, %arg6: memref<1x32xf32, #tpu.memory_space<vmem>>, %arg7: memref<16x1xf32, #tpu.memory_space<vmem>>, %arg8: memref<16x32xf32, #tpu.memory_space<vmem>>) attributes {dimension_semantics = [#tpu.dimension_semantics<parallel>], iteration_bounds = array<i64: 1>, scalar_prefetch = 0 : i64, scratch_operands = 0 : i64, tpu.core_type = #tpu.core_type<tc>, window_params = [{transform_indices = @transform_0, window_bounds = array<i64: 16, 32>}, {pipeline_mode = #tpu.pipeline_mode<synchronous>, transform_indices = @transform_1, window_bounds = array<i64: 32, 32>}, {pipeline_mode = #tpu.pipeline_mode<synchronous>, transform_indices = @transform_2, window_bounds = array<i64: 1, 32>}, {transform_indices = @transform_3, window_bounds = array<i64: 16, 32>}, {pipeline_mode = #tpu.pipeline_mode<synchronous>, transform_indices = @transform_4, window_bounds = array<i64: 1, 32>}, {pipeline_mode = #tpu.pipeline_mode<synchronous>, transform_indices = @transform_5, window_bounds = array<i64: 1, 32>}, {transform_indices = @transform_6, window_bounds = array<i64: 16, 1>}, {transform_indices = @transform_7, window_bounds = array<i64: 16, 32>}]} {
    %c0 = arith.constant 0 : index
    %c0_0 = arith.constant 0 : index
    %0 = vector.load %arg1[%c0, %c0_0] : memref<16x32xf32, #tpu.memory_space<vmem>>, vector<16x32xf32>
    %c0_1 = arith.constant 0 : index
    %c0_2 = arith.constant 0 : index
    %1 = vector.load %arg2[%c0_1, %c0_2] : memref<32x32xf32, #tpu.memory_space<vmem>>, vector<32x32xf32>
    %cst = arith.constant dense<0.000000e+00> : vector<16x32xf32>
    %2 = tpu.matmul %0, %1, %cst {dimension_numbers = #tpu.dot_dimension_numbers<[1], [0], [0], [1], [0, 0, 1, 1], [], []>} : vector<16x32xf32>, vector<32x32xf32>, vector<16x32xf32> -> vector<16x32xf32>
    %c0_3 = arith.constant 0 : index
    %c0_4 = arith.constant 0 : index
    %3 = vector.load %arg3[%c0_3, %c0_4] : memref<1x32xf32, #tpu.memory_space<vmem>>, vector<1x32xf32>
    %4 = vector.broadcast %3 : vector<1x32xf32> to vector<16x32xf32>
    %5 = arith.addf %2, %4 : vector<16x32xf32>
    %c0_5 = arith.constant 0 : index
    %c0_6 = arith.constant 0 : index
    %6 = vector.load %arg4[%c0_5, %c0_6] : memref<16x32xf32, #tpu.memory_space<vmem>>, vector<16x32xf32>
    %7 = arith.addf %5, %6 : vector<16x32xf32>
    %cst_7 = arith.constant dense<0.000000e+00> : vector<16xf32>
    %8 = vector.multi_reduction <add>, %7, %cst_7 [1] : vector<16x32xf32> to vector<16xf32>
    %9 = vector.shape_cast %8 : vector<16xf32> to vector<16x1xf32>
    %cst_8 = arith.constant 3.200000e+01 : f32
    %10 = vector.broadcast %cst_8 : f32 to vector<16x1xf32>
    %11 = arith.divf %9, %10 : vector<16x1xf32>
    %12 = vector.broadcast %11 : vector<16x1xf32> to vector<16x32xf32>
    %13 = arith.subf %7, %12 : vector<16x32xf32>
    %14 = arith.mulf %13, %13 : vector<16x32xf32>
    %cst_9 = arith.constant dense<0.000000e+00> : vector<16xf32>
    %15 = vector.multi_reduction <add>, %14, %cst_9 [1] : vector<16x32xf32> to vector<16xf32>
    %16 = vector.shape_cast %15 : vector<16xf32> to vector<16x1xf32>
    %cst_10 = arith.constant 3.200000e+01 : f32
    %17 = vector.broadcast %cst_10 : f32 to vector<16x1xf32>
    %18 = arith.divf %16, %17 : vector<16x1xf32>
    %cst_11 = arith.constant 9.99999974E-6 : f32
    %19 = vector.broadcast %cst_11 : f32 to vector<16x1xf32>
    %20 = arith.addf %18, %19 : vector<16x1xf32>
    %21 = math.rsqrt %20 : vector<16x1xf32>
    %22 = vector.broadcast %21 : vector<16x1xf32> to vector<16x32xf32>
    %23 = arith.mulf %13, %22 : vector<16x32xf32>
    %c0_12 = arith.constant 0 : index
    %c0_13 = arith.constant 0 : index
    %24 = vector.load %arg5[%c0_12, %c0_13] : memref<1x32xf32, #tpu.memory_space<vmem>>, vector<1x32xf32>
    %25 = vector.broadcast %24 : vector<1x32xf32> to vector<16x32xf32>
    %26 = arith.mulf %23, %25 : vector<16x32xf32>
    %c0_14 = arith.constant 0 : index
    %c0_15 = arith.constant 0 : index
    %27 = vector.load %arg6[%c0_14, %c0_15] : memref<1x32xf32, #tpu.memory_space<vmem>>, vector<1x32xf32>
    %28 = vector.broadcast %27 : vector<1x32xf32> to vector<16x32xf32>
    %29 = arith.addf %26, %28 : vector<16x32xf32>
    %c0_16 = arith.constant 0 : index
    %c0_17 = arith.constant 0 : index
    %30 = vector.load %arg7[%c0_16, %c0_17] : memref<16x1xf32, #tpu.memory_space<vmem>>, vector<16x1xf32>
    %31 = vector.broadcast %30 : vector<16x1xf32> to vector<16x32xf32>
    %32 = arith.mulf %29, %31 : vector<16x32xf32>
    %c0_18 = arith.constant 0 : index
    %c0_19 = arith.constant 0 : index
    %33 = vector.load %arg8[%c0_18, %c0_19] : memref<16x32xf32, #tpu.memory_space<vmem>>, vector<16x32xf32>
    tpu.vector_store %arg8[%c0_18, %c0_19], %32 {strides = array<i32>} : memref<16x32xf32, #tpu.memory_space<vmem>>, vector<16x32xf32>,
    return
  }
  func.func @transform_0(%arg0: i32) -> (i32, i32) {
    %c0_i32 = arith.constant 0 : i32
    %c0_i32_0 = arith.constant 0 : i32
    return %arg0, %c0_i32 : i32, i32
  }
  func.func @transform_1(%arg0: i32) -> (i32, i32) {
    %c0_i32 = arith.constant 0 : i32
    %c0_i32_0 = arith.constant 0 : i32
    %c0_i32_1 = arith.constant 0 : i32
    return %c0_i32, %c0_i32_0 : i32, i32
  }
  func.func @transform_2(%arg0: i32) -> (i32, i32) {
    %c0_i32 = arith.constant 0 : i32
    %c0_i32_0 = arith.constant 0 : i32
    %c0_i32_1 = arith.constant 0 : i32
    return %c0_i32, %c0_i32_0 : i32, i32
  }
  func.func @transform_3(%arg0: i32) -> (i32, i32) {
    %c0_i32 = arith.constant 0 : i32
    %c0_i32_0 = arith.constant 0 : i32
    return %arg0, %c0_i32 : i32, i32
  }
  func.func @transform_4(%arg0: i32) -> (i32, i32) {
    %c0_i32 = arith.constant 0 : i32
    %c0_i32_0 = arith.constant 0 : i32
    %c0_i32_1 = arith.constant 0 : i32
    return %c0_i32, %c0_i32_0 : i32, i32
  }
  func.func @transform_5(%arg0: i32) -> (i32, i32) {
    %c0_i32 = arith.constant 0 : i32
    %c0_i32_0 = arith.constant 0 : i32
    %c0_i32_1 = arith.constant 0 : i32
    return %c0_i32, %c0_i32_0 : i32, i32
  }
  func.func @transform_6(%arg0: i32) -> (i32, i32) {
    %c0_i32 = arith.constant 0 : i32
    %c0_i32_0 = arith.constant 0 : i32
    return %arg0, %c0_i32 : i32, i32
  }
  func.func @transform_7(%arg0: i32) -> (i32, i32) {
    %c0_i32 = arith.constant 0 : i32
    %c0_i32_0 = arith.constant 0 : i32
    return %arg0, %c0_i32 : i32, i32
  }
}

module attributes {stable_mosaic.version = 11 : i64} {
  func.func @_attention_kernel(%arg0: i32, %arg1: i32, %arg2: i32, %arg3: memref<1x8x96xf32, #tpu.memory_space<vmem>>, %arg4: memref<1x8x96xf32, #tpu.memory_space<vmem>>, %arg5: memref<1x1x8xf32, #tpu.memory_space<vmem>>, %arg6: memref<1x8x32xf32, #tpu.memory_space<vmem>>, %arg7: memref<4x8x8xf32, #tpu.memory_space<vmem>>, %arg8: memref<4x8x1xf32, #tpu.memory_space<vmem>>) attributes {dimension_semantics = [#tpu.dimension_semantics<parallel>, #tpu.dimension_semantics<parallel>, #tpu.dimension_semantics<arbitrary>], iteration_bounds = array<i64: 2, 1, 1>, scalar_prefetch = 0 : i64, scratch_operands = 2 : i64, tpu.core_type = #tpu.core_type<tc>, window_params = [{transform_indices = @transform_0, window_bounds = array<i64: 1, 8, 96>}, {transform_indices = @transform_1, window_bounds = array<i64: 1, 8, 96>}, {transform_indices = @transform_2, window_bounds = array<i64: 1, 1, 8>}, {transform_indices = @transform_3, window_bounds = array<i64: 1, 8, 32>}]} {
    %c0_i32 = arith.constant 0 : i32
    %0 = arith.cmpi eq, %arg2, %c0_i32 : i32
    %1 = arith.extui %0 : i1 to i32
    %c0_i32_0 = arith.constant 0 : i32
    %2 = arith.cmpi ne, %1, %c0_i32_0 : i32
    scf.if %2 {
      %cst_98 = arith.constant 0.000000e+00 : f32
      %132 = vector.broadcast %cst_98 : f32 to vector<4x8x8xf32>
      %c0_99 = arith.constant 0 : index
      %c0_100 = arith.constant 0 : index
      %c0_101 = arith.constant 0 : index
      %133 = vector.load %arg7[%c0_99, %c0_100, %c0_101] : memref<4x8x8xf32, #tpu.memory_space<vmem>>, vector<4x8x8xf32>
      tpu.vector_store %arg7[%c0_99, %c0_100, %c0_101], %132 {strides = array<i32>} : memref<4x8x8xf32, #tpu.memory_space<vmem>>, vector<4x8x8xf32>,
      %cst_102 = arith.constant 0.000000e+00 : f32
      %134 = vector.broadcast %cst_102 : f32 to vector<4x8x1xf32>
      %c0_103 = arith.constant 0 : index
      %c0_104 = arith.constant 0 : index
      %c0_105 = arith.constant 0 : index
      %135 = vector.load %arg8[%c0_103, %c0_104, %c0_105] : memref<4x8x1xf32, #tpu.memory_space<vmem>>, vector<4x8x1xf32>
      tpu.vector_store %arg8[%c0_103, %c0_104, %c0_105], %134 {strides = array<i32>} : memref<4x8x1xf32, #tpu.memory_space<vmem>>, vector<4x8x1xf32>,
    } else {
    }
    %c0 = arith.constant 0 : index
    %c0_1 = arith.constant 0 : index
    %c0_2 = arith.constant 0 : index
    %3 = vector.load %arg5[%c0, %c0_1, %c0_2] : memref<1x1x8xf32, #tpu.memory_space<vmem>>, vector<1x1x8xf32>
    %4 = vector.shape_cast %3 : vector<1x1x8xf32> to vector<1x8xf32>
    %c0_3 = arith.constant 0 : index
    %c0_4 = arith.constant 0 : index
    %c0_5 = arith.constant 0 : index
    %5 = vector.load %arg3[%c0_3, %c0_4, %c0_5] : memref<1x8x96xf32, #tpu.memory_space<vmem>>, vector<1x8x8xf32>
    %6 = vector.shape_cast %5 : vector<1x8x8xf32> to vector<8x8xf32>
    %cst = arith.constant 0.353553385 : f32
    %7 = vector.broadcast %cst : f32 to vector<8x8xf32>
    %8 = arith.mulf %6, %7 : vector<8x8xf32>
    %c0_6 = arith.constant 0 : index
    %c0_7 = arith.constant 0 : index
    %c32 = arith.constant 32 : index
    %9 = vector.load %arg4[%c0_6, %c0_7, %c32] : memref<1x8x96xf32, #tpu.memory_space<vmem>>, vector<1x8x8xf32>
    %10 = vector.shape_cast %9 : vector<1x8x8xf32> to vector<8x8xf32>
    %cst_8 = arith.constant dense<0.000000e+00> : vector<8x8xf32>
    %11 = tpu.matmul %8, %10, %cst_8 {dimension_numbers = #tpu.dot_dimension_numbers<[1], [1], [0], [0], [0, 0, 1, 0], [], []>} : vector<8x8xf32>, vector<8x8xf32>, vector<8x8xf32> -> vector<8x8xf32>
    %cst_9 = arith.constant 0.000000e+00 : f32
    %12 = vector.broadcast %cst_9 : f32 to vector<1x8xf32>
    %13 = arith.cmpf ogt, %4, %12 : vector<1x8xf32>
    %14 = math.exp %11 : vector<8x8xf32>
    %cst_10 = arith.constant 0.000000e+00 : f32
    %15 = vector.shape_cast %13 : vector<1x8xi1> to vector<1x8xi1>
    %16 = vector.broadcast %15 : vector<1x8xi1> to vector<8x8xi1>
    %17 = vector.broadcast %cst_10 : f32 to vector<8x8xf32>
    %18 = arith.select %16, %14, %17 : vector<8x8xi1>, vector<8x8xf32>
    %c0_11 = arith.constant 0 : index
    %c0_12 = arith.constant 0 : index
    %c0_13 = arith.constant 0 : index
    %19 = vector.load %arg8[%c0_11, %c0_12, %c0_13] : memref<4x8x1xf32, #tpu.memory_space<vmem>>, vector<1x8x1xf32>
    %20 = vector.shape_cast %19 : vector<1x8x1xf32> to vector<8x1xf32>
    %cst_14 = arith.constant dense<0.000000e+00> : vector<8xf32>
    %21 = vector.multi_reduction <add>, %18, %cst_14 [1] : vector<8x8xf32> to vector<8xf32>
    %22 = vector.shape_cast %21 : vector<8xf32> to vector<8x1xf32>
    %23 = arith.addf %20, %22 : vector<8x1xf32>
    %c0_15 = arith.constant 0 : index
    %c0_16 = arith.constant 0 : index
    %c0_17 = arith.constant 0 : index
    %24 = vector.load %arg8[%c0_15, %c0_16, %c0_17] : memref<4x8x1xf32, #tpu.memory_space<vmem>>, vector<1x8x1xf32>
    %25 = vector.shape_cast %24 : vector<1x8x1xf32> to vector<8x1xf32>
    %26 = vector.shape_cast %23 : vector<8x1xf32> to vector<1x8x1xf32>
    tpu.vector_store %arg8[%c0_15, %c0_16, %c0_17], %26 {strides = array<i32>} : memref<4x8x1xf32, #tpu.memory_space<vmem>>, vector<1x8x1xf32>,
    %c0_18 = arith.constant 0 : index
    %c0_19 = arith.constant 0 : index
    %c64 = arith.constant 64 : index
    %27 = vector.load %arg4[%c0_18, %c0_19, %c64] : memref<1x8x96xf32, #tpu.memory_space<vmem>>, vector<1x8x8xf32>
    %28 = vector.shape_cast %27 : vector<1x8x8xf32> to vector<8x8xf32>
    %c0_20 = arith.constant 0 : index
    %c0_21 = arith.constant 0 : index
    %c0_22 = arith.constant 0 : index
    %29 = vector.load %arg7[%c0_20, %c0_21, %c0_22] : memref<4x8x8xf32, #tpu.memory_space<vmem>>, vector<1x8x8xf32>
    %30 = vector.shape_cast %29 : vector<1x8x8xf32> to vector<8x8xf32>
    %cst_23 = arith.constant dense<0.000000e+00> : vector<8x8xf32>
    %31 = tpu.matmul %18, %28, %cst_23 {dimension_numbers = #tpu.dot_dimension_numbers<[1], [0], [0], [1], [0, 0, 1, 1], [], []>} : vector<8x8xf32>, vector<8x8xf32>, vector<8x8xf32> -> vector<8x8xf32>
    %32 = arith.addf %30, %31 : vector<8x8xf32>
    %c0_24 = arith.constant 0 : index
    %c0_25 = arith.constant 0 : index
    %c0_26 = arith.constant 0 : index
    %33 = vector.load %arg7[%c0_24, %c0_25, %c0_26] : memref<4x8x8xf32, #tpu.memory_space<vmem>>, vector<1x8x8xf32>
    %34 = vector.shape_cast %33 : vector<1x8x8xf32> to vector<8x8xf32>
    %35 = vector.shape_cast %32 : vector<8x8xf32> to vector<1x8x8xf32>
    tpu.vector_store %arg7[%c0_24, %c0_25, %c0_26], %35 {strides = array<i32>} : memref<4x8x8xf32, #tpu.memory_space<vmem>>, vector<1x8x8xf32>,
    %c0_27 = arith.constant 0 : index
    %c0_28 = arith.constant 0 : index
    %c8 = arith.constant 8 : index
    %36 = vector.load %arg3[%c0_27, %c0_28, %c8] : memref<1x8x96xf32, #tpu.memory_space<vmem>>, vector<1x8x8xf32>
    %37 = vector.shape_cast %36 : vector<1x8x8xf32> to vector<8x8xf32>
    %cst_29 = arith.constant 0.353553385 : f32
    %38 = vector.broadcast %cst_29 : f32 to vector<8x8xf32>
    %39 = arith.mulf %37, %38 : vector<8x8xf32>
    %c0_30 = arith.constant 0 : index
    %c0_31 = arith.constant 0 : index
    %c40 = arith.constant 40 : index
    %40 = vector.load %arg4[%c0_30, %c0_31, %c40] : memref<1x8x96xf32, #tpu.memory_space<vmem>>, vector<1x8x8xf32>
    %41 = vector.shape_cast %40 : vector<1x8x8xf32> to vector<8x8xf32>
    %cst_32 = arith.constant dense<0.000000e+00> : vector<8x8xf32>
    %42 = tpu.matmul %39, %41, %cst_32 {dimension_numbers = #tpu.dot_dimension_numbers<[1], [1], [0], [0], [0, 0, 1, 0], [], []>} : vector<8x8xf32>, vector<8x8xf32>, vector<8x8xf32> -> vector<8x8xf32>
    %cst_33 = arith.constant 0.000000e+00 : f32
    %43 = vector.broadcast %cst_33 : f32 to vector<1x8xf32>
    %44 = arith.cmpf ogt, %4, %43 : vector<1x8xf32>
    %45 = math.exp %42 : vector<8x8xf32>
    %cst_34 = arith.constant 0.000000e+00 : f32
    %46 = vector.shape_cast %44 : vector<1x8xi1> to vector<1x8xi1>
    %47 = vector.broadcast %46 : vector<1x8xi1> to vector<8x8xi1>
    %48 = vector.broadcast %cst_34 : f32 to vector<8x8xf32>
    %49 = arith.select %47, %45, %48 : vector<8x8xi1>, vector<8x8xf32>
    %c1 = arith.constant 1 : index
    %c0_35 = arith.constant 0 : index
    %c0_36 = arith.constant 0 : index
    %50 = vector.load %arg8[%c1, %c0_35, %c0_36] : memref<4x8x1xf32, #tpu.memory_space<vmem>>, vector<1x8x1xf32>
    %51 = vector.shape_cast %50 : vector<1x8x1xf32> to vector<8x1xf32>
    %cst_37 = arith.constant dense<0.000000e+00> : vector<8xf32>
    %52 = vector.multi_reduction <add>, %49, %cst_37 [1] : vector<8x8xf32> to vector<8xf32>
    %53 = vector.shape_cast %52 : vector<8xf32> to vector<8x1xf32>
    %54 = arith.addf %51, %53 : vector<8x1xf32>
    %c1_38 = arith.constant 1 : index
    %c0_39 = arith.constant 0 : index
    %c0_40 = arith.constant 0 : index
    %55 = vector.load %arg8[%c1_38, %c0_39, %c0_40] : memref<4x8x1xf32, #tpu.memory_space<vmem>>, vector<1x8x1xf32>
    %56 = vector.shape_cast %55 : vector<1x8x1xf32> to vector<8x1xf32>
    %57 = vector.shape_cast %54 : vector<8x1xf32> to vector<1x8x1xf32>
    tpu.vector_store %arg8[%c1_38, %c0_39, %c0_40], %57 {strides = array<i32>} : memref<4x8x1xf32, #tpu.memory_space<vmem>>, vector<1x8x1xf32>,
    %c0_41 = arith.constant 0 : index
    %c0_42 = arith.constant 0 : index
    %c72 = arith.constant 72 : index
    %58 = vector.load %arg4[%c0_41, %c0_42, %c72] : memref<1x8x96xf32, #tpu.memory_space<vmem>>, vector<1x8x8xf32>
    %59 = vector.shape_cast %58 : vector<1x8x8xf32> to vector<8x8xf32>
    %c1_43 = arith.constant 1 : index
    %c0_44 = arith.constant 0 : index
    %c0_45 = arith.constant 0 : index
    %60 = vector.load %arg7[%c1_43, %c0_44, %c0_45] : memref<4x8x8xf32, #tpu.memory_space<vmem>>, vector<1x8x8xf32>
    %61 = vector.shape_cast %60 : vector<1x8x8xf32> to vector<8x8xf32>
    %cst_46 = arith.constant dense<0.000000e+00> : vector<8x8xf32>
    %62 = tpu.matmul %49, %59, %cst_46 {dimension_numbers = #tpu.dot_dimension_numbers<[1], [0], [0], [1], [0, 0, 1, 1], [], []>} : vector<8x8xf32>, vector<8x8xf32>, vector<8x8xf32> -> vector<8x8xf32>
    %63 = arith.addf %61, %62 : vector<8x8xf32>
    %c1_47 = arith.constant 1 : index
    %c0_48 = arith.constant 0 : index
    %c0_49 = arith.constant 0 : index
    %64 = vector.load %arg7[%c1_47, %c0_48, %c0_49] : memref<4x8x8xf32, #tpu.memory_space<vmem>>, vector<1x8x8xf32>
    %65 = vector.shape_cast %64 : vector<1x8x8xf32> to vector<8x8xf32>
    %66 = vector.shape_cast %63 : vector<8x8xf32> to vector<1x8x8xf32>
    tpu.vector_store %arg7[%c1_47, %c0_48, %c0_49], %66 {strides = array<i32>} : memref<4x8x8xf32, #tpu.memory_space<vmem>>, vector<1x8x8xf32>,
    %c0_50 = arith.constant 0 : index
    %c0_51 = arith.constant 0 : index
    %c16 = arith.constant 16 : index
    %67 = vector.load %arg3[%c0_50, %c0_51, %c16] : memref<1x8x96xf32, #tpu.memory_space<vmem>>, vector<1x8x8xf32>
    %68 = vector.shape_cast %67 : vector<1x8x8xf32> to vector<8x8xf32>
    %cst_52 = arith.constant 0.353553385 : f32
    %69 = vector.broadcast %cst_52 : f32 to vector<8x8xf32>
    %70 = arith.mulf %68, %69 : vector<8x8xf32>
    %c0_53 = arith.constant 0 : index
    %c0_54 = arith.constant 0 : index
    %c48 = arith.constant 48 : index
    %71 = vector.load %arg4[%c0_53, %c0_54, %c48] : memref<1x8x96xf32, #tpu.memory_space<vmem>>, vector<1x8x8xf32>
    %72 = vector.shape_cast %71 : vector<1x8x8xf32> to vector<8x8xf32>
    %cst_55 = arith.constant dense<0.000000e+00> : vector<8x8xf32>
    %73 = tpu.matmul %70, %72, %cst_55 {dimension_numbers = #tpu.dot_dimension_numbers<[1], [1], [0], [0], [0, 0, 1, 0], [], []>} : vector<8x8xf32>, vector<8x8xf32>, vector<8x8xf32> -> vector<8x8xf32>
    %cst_56 = arith.constant 0.000000e+00 : f32
    %74 = vector.broadcast %cst_56 : f32 to vector<1x8xf32>
    %75 = arith.cmpf ogt, %4, %74 : vector<1x8xf32>
    %76 = math.exp %73 : vector<8x8xf32>
    %cst_57 = arith.constant 0.000000e+00 : f32
    %77 = vector.shape_cast %75 : vector<1x8xi1> to vector<1x8xi1>
    %78 = vector.broadcast %77 : vector<1x8xi1> to vector<8x8xi1>
    %79 = vector.broadcast %cst_57 : f32 to vector<8x8xf32>
    %80 = arith.select %78, %76, %79 : vector<8x8xi1>, vector<8x8xf32>
    %c2 = arith.constant 2 : index
    %c0_58 = arith.constant 0 : index
    %c0_59 = arith.constant 0 : index
    %81 = vector.load %arg8[%c2, %c0_58, %c0_59] : memref<4x8x1xf32, #tpu.memory_space<vmem>>, vector<1x8x1xf32>
    %82 = vector.shape_cast %81 : vector<1x8x1xf32> to vector<8x1xf32>
    %cst_60 = arith.constant dense<0.000000e+00> : vector<8xf32>
    %83 = vector.multi_reduction <add>, %80, %cst_60 [1] : vector<8x8xf32> to vector<8xf32>
    %84 = vector.shape_cast %83 : vector<8xf32> to vector<8x1xf32>
    %85 = arith.addf %82, %84 : vector<8x1xf32>
    %c2_61 = arith.constant 2 : index
    %c0_62 = arith.constant 0 : index
    %c0_63 = arith.constant 0 : index
    %86 = vector.load %arg8[%c2_61, %c0_62, %c0_63] : memref<4x8x1xf32, #tpu.memory_space<vmem>>, vector<1x8x1xf32>
    %87 = vector.shape_cast %86 : vector<1x8x1xf32> to vector<8x1xf32>
    %88 = vector.shape_cast %85 : vector<8x1xf32> to vector<1x8x1xf32>
    tpu.vector_store %arg8[%c2_61, %c0_62, %c0_63], %88 {strides = array<i32>} : memref<4x8x1xf32, #tpu.memory_space<vmem>>, vector<1x8x1xf32>,
    %c0_64 = arith.constant 0 : index
    %c0_65 = arith.constant 0 : index
    %c80 = arith.constant 80 : index
    %89 = vector.load %arg4[%c0_64, %c0_65, %c80] : memref<1x8x96xf32, #tpu.memory_space<vmem>>, vector<1x8x8xf32>
    %90 = vector.shape_cast %89 : vector<1x8x8xf32> to vector<8x8xf32>
    %c2_66 = arith.constant 2 : index
    %c0_67 = arith.constant 0 : index
    %c0_68 = arith.constant 0 : index
    %91 = vector.load %arg7[%c2_66, %c0_67, %c0_68] : memref<4x8x8xf32, #tpu.memory_space<vmem>>, vector<1x8x8xf32>
    %92 = vector.shape_cast %91 : vector<1x8x8xf32> to vector<8x8xf32>
    %cst_69 = arith.constant dense<0.000000e+00> : vector<8x8xf32>
    %93 = tpu.matmul %80, %90, %cst_69 {dimension_numbers = #tpu.dot_dimension_numbers<[1], [0], [0], [1], [0, 0, 1, 1], [], []>} : vector<8x8xf32>, vector<8x8xf32>, vector<8x8xf32> -> vector<8x8xf32>
    %94 = arith.addf %92, %93 : vector<8x8xf32>
    %c2_70 = arith.constant 2 : index
    %c0_71 = arith.constant 0 : index
    %c0_72 = arith.constant 0 : index
    %95 = vector.load %arg7[%c2_70, %c0_71, %c0_72] : memref<4x8x8xf32, #tpu.memory_space<vmem>>, vector<1x8x8xf32>
    %96 = vector.shape_cast %95 : vector<1x8x8xf32> to vector<8x8xf32>
    %97 = vector.shape_cast %94 : vector<8x8xf32> to vector<1x8x8xf32>
    tpu.vector_store %arg7[%c2_70, %c0_71, %c0_72], %97 {strides = array<i32>} : memref<4x8x8xf32, #tpu.memory_space<vmem>>, vector<1x8x8xf32>,
    %c0_73 = arith.constant 0 : index
    %c0_74 = arith.constant 0 : index
    %c24 = arith.constant 24 : index
    %98 = vector.load %arg3[%c0_73, %c0_74, %c24] : memref<1x8x96xf32, #tpu.memory_space<vmem>>, vector<1x8x8xf32>
    %99 = vector.shape_cast %98 : vector<1x8x8xf32> to vector<8x8xf32>
    %cst_75 = arith.constant 0.353553385 : f32
    %100 = vector.broadcast %cst_75 : f32 to vector<8x8xf32>
    %101 = arith.mulf %99, %100 : vector<8x8xf32>
    %c0_76 = arith.constant 0 : index
    %c0_77 = arith.constant 0 : index
    %c56 = arith.constant 56 : index
    %102 = vector.load %arg4[%c0_76, %c0_77, %c56] : memref<1x8x96xf32, #tpu.memory_space<vmem>>, vector<1x8x8xf32>
    %103 = vector.shape_cast %102 : vector<1x8x8xf32> to vector<8x8xf32>
    %cst_78 = arith.constant dense<0.000000e+00> : vector<8x8xf32>
    %104 = tpu.matmul %101, %103, %cst_78 {dimension_numbers = #tpu.dot_dimension_numbers<[1], [1], [0], [0], [0, 0, 1, 0], [], []>} : vector<8x8xf32>, vector<8x8xf32>, vector<8x8xf32> -> vector<8x8xf32>
    %cst_79 = arith.constant 0.000000e+00 : f32
    %105 = vector.broadcast %cst_79 : f32 to vector<1x8xf32>
    %106 = arith.cmpf ogt, %4, %105 : vector<1x8xf32>
    %107 = math.exp %104 : vector<8x8xf32>
    %cst_80 = arith.constant 0.000000e+00 : f32
    %108 = vector.shape_cast %106 : vector<1x8xi1> to vector<1x8xi1>
    %109 = vector.broadcast %108 : vector<1x8xi1> to vector<8x8xi1>
    %110 = vector.broadcast %cst_80 : f32 to vector<8x8xf32>
    %111 = arith.select %109, %107, %110 : vector<8x8xi1>, vector<8x8xf32>
    %c3 = arith.constant 3 : index
    %c0_81 = arith.constant 0 : index
    %c0_82 = arith.constant 0 : index
    %112 = vector.load %arg8[%c3, %c0_81, %c0_82] : memref<4x8x1xf32, #tpu.memory_space<vmem>>, vector<1x8x1xf32>
    %113 = vector.shape_cast %112 : vector<1x8x1xf32> to vector<8x1xf32>
    %cst_83 = arith.constant dense<0.000000e+00> : vector<8xf32>
    %114 = vector.multi_reduction <add>, %111, %cst_83 [1] : vector<8x8xf32> to vector<8xf32>
    %115 = vector.shape_cast %114 : vector<8xf32> to vector<8x1xf32>
    %116 = arith.addf %113, %115 : vector<8x1xf32>
    %c3_84 = arith.constant 3 : index
    %c0_85 = arith.constant 0 : index
    %c0_86 = arith.constant 0 : index
    %117 = vector.load %arg8[%c3_84, %c0_85, %c0_86] : memref<4x8x1xf32, #tpu.memory_space<vmem>>, vector<1x8x1xf32>
    %118 = vector.shape_cast %117 : vector<1x8x1xf32> to vector<8x1xf32>
    %119 = vector.shape_cast %116 : vector<8x1xf32> to vector<1x8x1xf32>
    tpu.vector_store %arg8[%c3_84, %c0_85, %c0_86], %119 {strides = array<i32>} : memref<4x8x1xf32, #tpu.memory_space<vmem>>, vector<1x8x1xf32>,
    %c0_87 = arith.constant 0 : index
    %c0_88 = arith.constant 0 : index
    %c88 = arith.constant 88 : index
    %120 = vector.load %arg4[%c0_87, %c0_88, %c88] : memref<1x8x96xf32, #tpu.memory_space<vmem>>, vector<1x8x8xf32>
    %121 = vector.shape_cast %120 : vector<1x8x8xf32> to vector<8x8xf32>
    %c3_89 = arith.constant 3 : index
    %c0_90 = arith.constant 0 : index
    %c0_91 = arith.constant 0 : index
    %122 = vector.load %arg7[%c3_89, %c0_90, %c0_91] : memref<4x8x8xf32, #tpu.memory_space<vmem>>, vector<1x8x8xf32>
    %123 = vector.shape_cast %122 : vector<1x8x8xf32> to vector<8x8xf32>
    %cst_92 = arith.constant dense<0.000000e+00> : vector<8x8xf32>
    %124 = tpu.matmul %111, %121, %cst_92 {dimension_numbers = #tpu.dot_dimension_numbers<[1], [0], [0], [1], [0, 0, 1, 1], [], []>} : vector<8x8xf32>, vector<8x8xf32>, vector<8x8xf32> -> vector<8x8xf32>
    %125 = arith.addf %123, %124 : vector<8x8xf32>
    %c3_93 = arith.constant 3 : index
    %c0_94 = arith.constant 0 : index
    %c0_95 = arith.constant 0 : index
    %126 = vector.load %arg7[%c3_93, %c0_94, %c0_95] : memref<4x8x8xf32, #tpu.memory_space<vmem>>, vector<1x8x8xf32>
    %127 = vector.shape_cast %126 : vector<1x8x8xf32> to vector<8x8xf32>
    %128 = vector.shape_cast %125 : vector<8x8xf32> to vector<1x8x8xf32>
    tpu.vector_store %arg7[%c3_93, %c0_94, %c0_95], %128 {strides = array<i32>} : memref<4x8x8xf32, #tpu.memory_space<vmem>>, vector<1x8x8xf32>,
    %c0_i32_96 = arith.constant 0 : i32
    %129 = arith.cmpi eq, %arg2, %c0_i32_96 : i32
    %130 = arith.extui %129 : i1 to i32
    %c0_i32_97 = arith.constant 0 : i32
    %131 = arith.cmpi ne, %130, %c0_i32_97 : i32
    scf.if %131 {
      %c0_98 = arith.constant 0 : index
      %c0_99 = arith.constant 0 : index
      %c0_100 = arith.constant 0 : index
      %132 = vector.load %arg8[%c0_98, %c0_99, %c0_100] : memref<4x8x1xf32, #tpu.memory_space<vmem>>, vector<1x8x1xf32>
      %133 = vector.shape_cast %132 : vector<1x8x1xf32> to vector<8x1xf32>
      %cst_101 = arith.constant 1.000000e-10 : f32
      %134 = vector.broadcast %cst_101 : f32 to vector<8x1xf32>
      %135 = arith.addf %133, %134 : vector<8x1xf32>
      %136 = tpu.reciprocal %135 {approx = true} : vector<8x1xf32> -> vector<8x1xf32>
      %c0_102 = arith.constant 0 : index
      %c0_103 = arith.constant 0 : index
      %c0_104 = arith.constant 0 : index
      %137 = vector.load %arg7[%c0_102, %c0_103, %c0_104] : memref<4x8x8xf32, #tpu.memory_space<vmem>>, vector<1x8x8xf32>
      %138 = vector.shape_cast %137 : vector<1x8x8xf32> to vector<8x8xf32>
      %139 = vector.broadcast %136 : vector<8x1xf32> to vector<8x8xf32>
      %140 = arith.mulf %138, %139 : vector<8x8xf32>
      %c1_105 = arith.constant 1 : index
      %c0_106 = arith.constant 0 : index
      %c0_107 = arith.constant 0 : index
      %141 = vector.load %arg8[%c1_105, %c0_106, %c0_107] : memref<4x8x1xf32, #tpu.memory_space<vmem>>, vector<1x8x1xf32>
      %142 = vector.shape_cast %141 : vector<1x8x1xf32> to vector<8x1xf32>
      %cst_108 = arith.constant 1.000000e-10 : f32
      %143 = vector.broadcast %cst_108 : f32 to vector<8x1xf32>
      %144 = arith.addf %142, %143 : vector<8x1xf32>
      %145 = tpu.reciprocal %144 {approx = true} : vector<8x1xf32> -> vector<8x1xf32>
      %c1_109 = arith.constant 1 : index
      %c0_110 = arith.constant 0 : index
      %c0_111 = arith.constant 0 : index
      %146 = vector.load %arg7[%c1_109, %c0_110, %c0_111] : memref<4x8x8xf32, #tpu.memory_space<vmem>>, vector<1x8x8xf32>
      %147 = vector.shape_cast %146 : vector<1x8x8xf32> to vector<8x8xf32>
      %148 = vector.broadcast %145 : vector<8x1xf32> to vector<8x8xf32>
      %149 = arith.mulf %147, %148 : vector<8x8xf32>
      %c2_112 = arith.constant 2 : index
      %c0_113 = arith.constant 0 : index
      %c0_114 = arith.constant 0 : index
      %150 = vector.load %arg8[%c2_112, %c0_113, %c0_114] : memref<4x8x1xf32, #tpu.memory_space<vmem>>, vector<1x8x1xf32>
      %151 = vector.shape_cast %150 : vector<1x8x1xf32> to vector<8x1xf32>
      %cst_115 = arith.constant 1.000000e-10 : f32
      %152 = vector.broadcast %cst_115 : f32 to vector<8x1xf32>
      %153 = arith.addf %151, %152 : vector<8x1xf32>
      %154 = tpu.reciprocal %153 {approx = true} : vector<8x1xf32> -> vector<8x1xf32>
      %c2_116 = arith.constant 2 : index
      %c0_117 = arith.constant 0 : index
      %c0_118 = arith.constant 0 : index
      %155 = vector.load %arg7[%c2_116, %c0_117, %c0_118] : memref<4x8x8xf32, #tpu.memory_space<vmem>>, vector<1x8x8xf32>
      %156 = vector.shape_cast %155 : vector<1x8x8xf32> to vector<8x8xf32>
      %157 = vector.broadcast %154 : vector<8x1xf32> to vector<8x8xf32>
      %158 = arith.mulf %156, %157 : vector<8x8xf32>
      %c3_119 = arith.constant 3 : index
      %c0_120 = arith.constant 0 : index
      %c0_121 = arith.constant 0 : index
      %159 = vector.load %arg8[%c3_119, %c0_120, %c0_121] : memref<4x8x1xf32, #tpu.memory_space<vmem>>, vector<1x8x1xf32>
      %160 = vector.shape_cast %159 : vector<1x8x1xf32> to vector<8x1xf32>
      %cst_122 = arith.constant 1.000000e-10 : f32
      %161 = vector.broadcast %cst_122 : f32 to vector<8x1xf32>
      %162 = arith.addf %160, %161 : vector<8x1xf32>
      %163 = tpu.reciprocal %162 {approx = true} : vector<8x1xf32> -> vector<8x1xf32>
      %c3_123 = arith.constant 3 : index
      %c0_124 = arith.constant 0 : index
      %c0_125 = arith.constant 0 : index
      %164 = vector.load %arg7[%c3_123, %c0_124, %c0_125] : memref<4x8x8xf32, #tpu.memory_space<vmem>>, vector<1x8x8xf32>
      %165 = vector.shape_cast %164 : vector<1x8x8xf32> to vector<8x8xf32>
      %166 = vector.broadcast %163 : vector<8x1xf32> to vector<8x8xf32>
      %167 = arith.mulf %165, %166 : vector<8x8xf32>
      %168 = tpu.concatenate %140, %149, %158, %167 in 1 : vector<8x8xf32>, vector<8x8xf32>, vector<8x8xf32>, vector<8x8xf32> -> vector<8x32xf32>
      %c0_126 = arith.constant 0 : index
      %c0_127 = arith.constant 0 : index
      %c0_128 = arith.constant 0 : index
      %169 = vector.load %arg6[%c0_126, %c0_127, %c0_128] : memref<1x8x32xf32, #tpu.memory_space<vmem>>, vector<1x8x32xf32>
      %170 = vector.shape_cast %169 : vector<1x8x32xf32> to vector<8x32xf32>
      %171 = vector.shape_cast %168 : vector<8x32xf32> to vector<1x8x32xf32>
      tpu.vector_store %arg6[%c0_126, %c0_127, %c0_128], %171 {strides = array<i32>} : memref<1x8x32xf32, #tpu.memory_space<vmem>>, vector<1x8x32xf32>,
    } else {
    }
    return
  }
  func.func @transform_0(%arg0: i32, %arg1: i32, %arg2: i32) -> (i32, i32, i32) {
    %c0_i32 = arith.constant 0 : i32
    %c0_i32_0 = arith.constant 0 : i32
    return %arg0, %arg1, %c0_i32 : i32, i32, i32
  }
  func.func @transform_1(%arg0: i32, %arg1: i32, %arg2: i32) -> (i32, i32, i32) {
    %c0_i32 = arith.constant 0 : i32
    %c0_i32_0 = arith.constant 0 : i32
    return %arg0, %arg2, %c0_i32 : i32, i32, i32
  }
  func.func @transform_2(%arg0: i32, %arg1: i32, %arg2: i32) -> (i32, i32, i32) {
    %c0_i32 = arith.constant 0 : i32
    %c0_i32_0 = arith.constant 0 : i32
    return %arg0, %c0_i32, %arg2 : i32, i32, i32
  }
  func.func @transform_3(%arg0: i32, %arg1: i32, %arg2: i32) -> (i32, i32, i32) {
    %c0_i32 = arith.constant 0 : i32
    %c0_i32_0 = arith.constant 0 : i32
    return %arg0, %arg1, %c0_i32 : i32, i32, i32
  }
}

module attributes {stable_mosaic.version = 11 : i64} {
  func.func @_ffn_residual_ln_kernel(%arg0: i32, %arg1: i32, %arg2: memref<16x32xf32, #tpu.memory_space<vmem>>, %arg3: memref<32x64xf32, #tpu.memory_space<vmem>>, %arg4: memref<1x64xf32, #tpu.memory_space<vmem>>, %arg5: memref<64x32xf32, #tpu.memory_space<vmem>>, %arg6: memref<1x32xf32, #tpu.memory_space<vmem>>, %arg7: memref<1x32xf32, #tpu.memory_space<vmem>>, %arg8: memref<1x32xf32, #tpu.memory_space<vmem>>, %arg9: memref<16x1xf32, #tpu.memory_space<vmem>>, %arg10: memref<16x32xf32, #tpu.memory_space<vmem>>, %arg11: memref<16x32xf32, #tpu.memory_space<vmem>>) attributes {dimension_semantics = [#tpu.dimension_semantics<parallel>, #tpu.dimension_semantics<arbitrary>], iteration_bounds = array<i64: 1, 1>, scalar_prefetch = 0 : i64, scratch_operands = 1 : i64, tpu.core_type = #tpu.core_type<tc>, window_params = [{transform_indices = @transform_0, window_bounds = array<i64: 16, 32>}, {transform_indices = @transform_1, window_bounds = array<i64: 32, 64>}, {transform_indices = @transform_2, window_bounds = array<i64: 1, 64>}, {transform_indices = @transform_3, window_bounds = array<i64: 64, 32>}, {pipeline_mode = #tpu.pipeline_mode<synchronous>, transform_indices = @transform_4, window_bounds = array<i64: 1, 32>}, {pipeline_mode = #tpu.pipeline_mode<synchronous>, transform_indices = @transform_5, window_bounds = array<i64: 1, 32>}, {pipeline_mode = #tpu.pipeline_mode<synchronous>, transform_indices = @transform_6, window_bounds = array<i64: 1, 32>}, {transform_indices = @transform_7, window_bounds = array<i64: 16, 1>}, {transform_indices = @transform_8, window_bounds = array<i64: 16, 32>}]} {
    %c0_i32 = arith.constant 0 : i32
    %0 = arith.cmpi eq, %arg1, %c0_i32 : i32
    %1 = arith.extui %0 : i1 to i32
    %c0_i32_0 = arith.constant 0 : i32
    %2 = arith.cmpi ne, %1, %c0_i32_0 : i32
    scf.if %2 {
      %cst_16 = arith.constant 0.000000e+00 : f32
      %19 = vector.broadcast %cst_16 : f32 to vector<16x32xf32>
      %c0_17 = arith.constant 0 : index
      %c0_18 = arith.constant 0 : index
      %20 = vector.load %arg11[%c0_17, %c0_18] : memref<16x32xf32, #tpu.memory_space<vmem>>, vector<16x32xf32>
      tpu.vector_store %arg11[%c0_17, %c0_18], %19 {strides = array<i32>} : memref<16x32xf32, #tpu.memory_space<vmem>>, vector<16x32xf32>,
    } else {
    }
    %c0 = arith.constant 0 : index
    %c0_1 = arith.constant 0 : index
    %3 = vector.load %arg2[%c0, %c0_1] : memref<16x32xf32, #tpu.memory_space<vmem>>, vector<16x32xf32>
    %c0_2 = arith.constant 0 : index
    %c0_3 = arith.constant 0 : index
    %4 = vector.load %arg3[%c0_2, %c0_3] : memref<32x64xf32, #tpu.memory_space<vmem>>, vector<32x64xf32>
    %cst = arith.constant dense<0.000000e+00> : vector<16x64xf32>
    %5 = tpu.matmul %3, %4, %cst {dimension_numbers = #tpu.dot_dimension_numbers<[1], [0], [0], [1], [0, 0, 1, 1], [], []>} : vector<16x32xf32>, vector<32x64xf32>, vector<16x64xf32> -> vector<16x64xf32>
    %c0_4 = arith.constant 0 : index
    %c0_5 = arith.constant 0 : index
    %6 = vector.load %arg4[%c0_4, %c0_5] : memref<1x64xf32, #tpu.memory_space<vmem>>, vector<1x64xf32>
    %7 = vector.broadcast %6 : vector<1x64xf32> to vector<16x64xf32>
    %8 = arith.addf %5, %7 : vector<16x64xf32>
    %cst_6 = arith.constant 0.000000e+00 : f32
    %9 = vector.broadcast %cst_6 : f32 to vector<16x64xf32>
    %10 = arith.maximumf %8, %9 : vector<16x64xf32>
    %c0_7 = arith.constant 0 : index
    %c0_8 = arith.constant 0 : index
    %11 = vector.load %arg11[%c0_7, %c0_8] : memref<16x32xf32, #tpu.memory_space<vmem>>, vector<16x32xf32>
    %c0_9 = arith.constant 0 : index
    %c0_10 = arith.constant 0 : index
    %12 = vector.load %arg5[%c0_9, %c0_10] : memref<64x32xf32, #tpu.memory_space<vmem>>, vector<64x32xf32>
    %cst_11 = arith.constant dense<0.000000e+00> : vector<16x32xf32>
    %13 = tpu.matmul %10, %12, %cst_11 {dimension_numbers = #tpu.dot_dimension_numbers<[1], [0], [0], [1], [0, 0, 1, 1], [], []>} : vector<16x64xf32>, vector<64x32xf32>, vector<16x32xf32> -> vector<16x32xf32>
    %14 = arith.addf %11, %13 : vector<16x32xf32>
    %c0_12 = arith.constant 0 : index
    %c0_13 = arith.constant 0 : index
    %15 = vector.load %arg11[%c0_12, %c0_13] : memref<16x32xf32, #tpu.memory_space<vmem>>, vector<16x32xf32>
    tpu.vector_store %arg11[%c0_12, %c0_13], %14 {strides = array<i32>} : memref<16x32xf32, #tpu.memory_space<vmem>>, vector<16x32xf32>,
    %c0_i32_14 = arith.constant 0 : i32
    %16 = arith.cmpi eq, %arg1, %c0_i32_14 : i32
    %17 = arith.extui %16 : i1 to i32
    %c0_i32_15 = arith.constant 0 : i32
    %18 = arith.cmpi ne, %17, %c0_i32_15 : i32
    scf.if %18 {
      %c0_16 = arith.constant 0 : index
      %c0_17 = arith.constant 0 : index
      %19 = vector.load %arg11[%c0_16, %c0_17] : memref<16x32xf32, #tpu.memory_space<vmem>>, vector<16x32xf32>
      %c0_18 = arith.constant 0 : index
      %c0_19 = arith.constant 0 : index
      %20 = vector.load %arg6[%c0_18, %c0_19] : memref<1x32xf32, #tpu.memory_space<vmem>>, vector<1x32xf32>
      %21 = vector.broadcast %20 : vector<1x32xf32> to vector<16x32xf32>
      %22 = arith.addf %19, %21 : vector<16x32xf32>
      %23 = arith.addf %22, %3 : vector<16x32xf32>
      %cst_20 = arith.constant dense<0.000000e+00> : vector<16xf32>
      %24 = vector.multi_reduction <add>, %23, %cst_20 [1] : vector<16x32xf32> to vector<16xf32>
      %25 = vector.shape_cast %24 : vector<16xf32> to vector<16x1xf32>
      %cst_21 = arith.constant 3.200000e+01 : f32
      %26 = vector.broadcast %cst_21 : f32 to vector<16x1xf32>
      %27 = arith.divf %25, %26 : vector<16x1xf32>
      %28 = vector.broadcast %27 : vector<16x1xf32> to vector<16x32xf32>
      %29 = arith.subf %23, %28 : vector<16x32xf32>
      %30 = arith.mulf %29, %29 : vector<16x32xf32>
      %cst_22 = arith.constant dense<0.000000e+00> : vector<16xf32>
      %31 = vector.multi_reduction <add>, %30, %cst_22 [1] : vector<16x32xf32> to vector<16xf32>
      %32 = vector.shape_cast %31 : vector<16xf32> to vector<16x1xf32>
      %cst_23 = arith.constant 3.200000e+01 : f32
      %33 = vector.broadcast %cst_23 : f32 to vector<16x1xf32>
      %34 = arith.divf %32, %33 : vector<16x1xf32>
      %cst_24 = arith.constant 9.99999974E-6 : f32
      %35 = vector.broadcast %cst_24 : f32 to vector<16x1xf32>
      %36 = arith.addf %34, %35 : vector<16x1xf32>
      %37 = math.rsqrt %36 : vector<16x1xf32>
      %38 = vector.broadcast %37 : vector<16x1xf32> to vector<16x32xf32>
      %39 = arith.mulf %29, %38 : vector<16x32xf32>
      %c0_25 = arith.constant 0 : index
      %c0_26 = arith.constant 0 : index
      %40 = vector.load %arg7[%c0_25, %c0_26] : memref<1x32xf32, #tpu.memory_space<vmem>>, vector<1x32xf32>
      %41 = vector.broadcast %40 : vector<1x32xf32> to vector<16x32xf32>
      %42 = arith.mulf %39, %41 : vector<16x32xf32>
      %c0_27 = arith.constant 0 : index
      %c0_28 = arith.constant 0 : index
      %43 = vector.load %arg8[%c0_27, %c0_28] : memref<1x32xf32, #tpu.memory_space<vmem>>, vector<1x32xf32>
      %44 = vector.broadcast %43 : vector<1x32xf32> to vector<16x32xf32>
      %45 = arith.addf %42, %44 : vector<16x32xf32>
      %c0_29 = arith.constant 0 : index
      %c0_30 = arith.constant 0 : index
      %46 = vector.load %arg9[%c0_29, %c0_30] : memref<16x1xf32, #tpu.memory_space<vmem>>, vector<16x1xf32>
      %47 = vector.broadcast %46 : vector<16x1xf32> to vector<16x32xf32>
      %48 = arith.mulf %45, %47 : vector<16x32xf32>
      %c0_31 = arith.constant 0 : index
      %c0_32 = arith.constant 0 : index
      %49 = vector.load %arg10[%c0_31, %c0_32] : memref<16x32xf32, #tpu.memory_space<vmem>>, vector<16x32xf32>
      tpu.vector_store %arg10[%c0_31, %c0_32], %48 {strides = array<i32>} : memref<16x32xf32, #tpu.memory_space<vmem>>, vector<16x32xf32>,
    } else {
    }
    return
  }
  func.func @transform_0(%arg0: i32, %arg1: i32) -> (i32, i32) {
    %c0_i32 = arith.constant 0 : i32
    %c0_i32_0 = arith.constant 0 : i32
    return %arg0, %c0_i32 : i32, i32
  }
  func.func @transform_1(%arg0: i32, %arg1: i32) -> (i32, i32) {
    %c0_i32 = arith.constant 0 : i32
    %c0_i32_0 = arith.constant 0 : i32
    return %c0_i32, %arg1 : i32, i32
  }
  func.func @transform_2(%arg0: i32, %arg1: i32) -> (i32, i32) {
    %c0_i32 = arith.constant 0 : i32
    %c0_i32_0 = arith.constant 0 : i32
    return %c0_i32, %arg1 : i32, i32
  }
  func.func @transform_3(%arg0: i32, %arg1: i32) -> (i32, i32) {
    %c0_i32 = arith.constant 0 : i32
    %c0_i32_0 = arith.constant 0 : i32
    return %arg1, %c0_i32 : i32, i32
  }
  func.func @transform_4(%arg0: i32, %arg1: i32) -> (i32, i32) {
    %c0_i32 = arith.constant 0 : i32
    %c0_i32_0 = arith.constant 0 : i32
    %c0_i32_1 = arith.constant 0 : i32
    return %c0_i32, %c0_i32_0 : i32, i32
  }
  func.func @transform_5(%arg0: i32, %arg1: i32) -> (i32, i32) {
    %c0_i32 = arith.constant 0 : i32
    %c0_i32_0 = arith.constant 0 : i32
    %c0_i32_1 = arith.constant 0 : i32
    return %c0_i32, %c0_i32_0 : i32, i32
  }
  func.func @transform_6(%arg0: i32, %arg1: i32) -> (i32, i32) {
    %c0_i32 = arith.constant 0 : i32
    %c0_i32_0 = arith.constant 0 : i32
    %c0_i32_1 = arith.constant 0 : i32
    return %c0_i32, %c0_i32_0 : i32, i32
  }
  func.func @transform_7(%arg0: i32, %arg1: i32) -> (i32, i32) {
    %c0_i32 = arith.constant 0 : i32
    %c0_i32_0 = arith.constant 0 : i32
    return %arg0, %c0_i32 : i32, i32
  }
  func.func @transform_8(%arg0: i32, %arg1: i32) -> (i32, i32) {
    %c0_i32 = arith.constant 0 : i32
    %c0_i32_0 = arith.constant 0 : i32
    return %arg0, %c0_i32 : i32, i32
  }
}

</mosaic_0001>

<bundles_post_ra>
// kernel: transformer_encoder_forward.7
= control target key start
LH: loop header
LB: loop body
LE: loop exit
PB: predicated region body
PF: predicated region fallthrough
CT: control target
= control target key end

     0   :  { %vm39_vm0 = vcmask 261120   ;;  %v227_v19 = vmov 0   ;;  %s321_s1 = inlined_call_operand.vmem [shape: f32[32,32], index: 1, kind: input, shape index: {}]   ;;  %s322_s0 = inlined_call_operand.vmem [shape: f32[16,32], index: 0, kind: input, shape index: {}]   ;;  %s323_s2 = inlined_call_operand.vmem [shape: f32[1,32], index: 2, kind: input, shape index: {}]   ;;  %s324_s3 = inlined_call_operand.vmem [shape: f32[16,32], index: 3, kind: input, shape index: {}]   ;;  %s325_s6 = inlined_call_operand.vmem [shape: f32[16,1], index: 6, kind: input, shape index: {}]   ;;  %s326_s4 = inlined_call_operand.vmem [shape: f32[1,32], index: 4, kind: input, shape index: {}]   ;;  %s327_s5 = inlined_call_operand.vmem [shape: f32[1,32], index: 5, kind: input, shape index: {}]   ;;  %s328_s7 = inlined_call_operand.vmem [shape: f32[16,32], index: 7, kind: output, shape index: {}]  }
   0x1   :  { %v28_v0 = vld [vmem:[%s321_s1] sm:$0xff]  ;;  %v29_v1 = vld [vmem:[%s321_s1 + $0x8] sm:$0xff]  ;;  %v30_v2 = vld [vmem:[%s321_s1 + $0x10] sm:$0xff]  ;;  %222 = vset.pattern.permute.xlu1 %v227_v19  ;;  %221 = vset.pattern.permute.xlu0 %v227_v19 }
   0x2   :  { %v212_v3 = vpack.c.bf16 %v29_v1, %v28_v0  ;;  %v31_v4 = vld [vmem:[%s321_s1 + $0x18] sm:$0xff]  ;;  %v26_v5 = vld [vmem:[%s322_s0] sm:$0xff]  ;;  %v27_v7 = vld [vmem:[%s322_s0 + $0x8] sm:$0xff] }
   0x3   :  { %v216_v6 = vpack.c.bf16 %v31_v4, %v30_v2  ;;  %209 = vmatprep.mubr.msk.f32.mxu0 %vm39_vm0, %v26_v5  ;;  %v190_v8 = vld [vmem:[%s323_s2] ss:$0 sm:$0xff]  ;;  %v122_v14 = vld [vmem:[%s324_s3 + $0x8] sm:$0xff] }
   0x4   :  { %213 = vmatprep.subr.bf16.mxu0 %v212_v3  ;;  %v121_v11 = vld [vmem:[%s324_s3] sm:$0xff]  ;;  %v171_v31 = vld [vmem:[%s325_s6 + $0x8] sm:$0xff] }
   0x5   :  { %215 = vmatpush3.bf16.msra.mxu0 %v212_v3  ;;  %v170_v20 = vld [vmem:[%s325_s6] sm:$0xff] }
   0x6   :  { %217 = vmatprep.subr.bf16.mxu0 %v216_v6  ;;  %v193_v39 = vld [vmem:[%s326_s4] ss:$0 sm:$0xff] }
   0x7   :  { %v194_v41 = vld [vmem:[%s327_s5] ss:$0 sm:$0xff] }
   0x9   :  { %219 = vmatpush3.bf16.msra.mxu0 %v216_v6 }
   0xc   :  { %210 = vmatmul.mubr.msk.f32.vlgmr.msra.gmra.mrb[0].mxu0 %vm39_vm0, %v27_v7 }
  0xdf   :  { %v211_v9 = vpop.f32.mrb[0].mxu0 }
  0xe0   :  { %v112_v10 = vpop.f32.mrb[1].mxu0  ;;  %v118_v12 = vadd.f32 %v211_v9, %v190_v8 }
  0xe1   :  { %v113_v13 = vadd.f32 %v190_v8, %v112_v10 }
  0xe2   :  { %v124_v17 = vadd.f32 %v122_v14, %v118_v12 }
  0xe3   :  { %v123_v15 = vadd.f32 %v121_v11, %v113_v13 }
  0xe4   :  { %v128_v18 = vsel %vm39_vm0, %v124_v17, 0.0 }
  0xe5   :  { %v125_v16 = vsel %vm39_vm0, %v123_v15, 0.0 }
  0xe6   :  { %126 = vadd.xlane.f32.xlu0 %v125_v16 }
  0xea   :  { %129 = vadd.xlane.f32.xlu0 %v128_v18 }
 0x100   :  { %174 = vperm.xlu0 %221, %v170_v20  }
 0x173   :  { %v127_v21 = vpop.xlane.xlu0 %126 }
 0x174   :  { %v132_v22 = vmul.f32 0.03125, %v127_v21 }
 0x176   :  { %v134_v25 = vsub.f32 %v123_v15, %v132_v22 }
 0x177   :  { %v130_v23 = vpop.xlane.xlu0 %129 }
 0x178   :  { %v133_v24 = vmul.f32 0.03125, %v130_v23  ;;  %v136_v29 = vmul.f32 %v134_v25, %v134_v25 }
 0x17a   :  { %v135_v26 = vsub.f32 %v124_v17, %v133_v24  ;;  %v138_v30 = vsel %vm39_vm0, %v136_v29, 0.0 }
 0x17c   :  { %v137_v27 = vmul.f32 %v135_v26, %v135_v26 }
 0x17e   :  { %v141_v28 = vsel %vm39_vm0, %v137_v27, 0.0 }
 0x17f   :  { %142 = vadd.xlane.f32.xlu1 %v141_v28  ;;  %v175_v49 = vpop.permute.xlu0 %174 }
 0x183   :  { %139 = vadd.xlane.f32.xlu1 %v138_v30 }
 0x194   :  { %179 = vperm.xlu1 %222, %v171_v31  }
 0x20c   :  { %v143_v32 = vpop.xlane.xlu1 %142 }
 0x20d   :  { %v145_v33 = vmul.f32 0.03125, %v143_v32 }
 0x20f   :  { %v147_v34 = vadd.f32 1e-05, %v145_v33 }
 0x210   :  { %v140_v35 = vpop.xlane.xlu1 %139 }
 0x211   :  { %223 = vrsqrt.f32 %v147_v34  ;;  %v144_v36 = vmul.f32 0.03125, %v140_v35 }
 0x213   :  { %v146_v37 = vadd.f32 1e-05, %v144_v36 }
 0x214   :  { %v180_v44 = vpop.permute.xlu1 %179 }
 0x215   :  { %225 = vrsqrt.f32 %v146_v37 }
 0x21b   :  { %v224_v38 = vpop.eup %223 }
 0x21c   :  { %v151_v40 = vmul.f32 %v224_v38, %v135_v26 }
 0x21e   :  { %v160_v42 = vmul.f32 %v193_v39, %v151_v40 }
 0x21f   :  { %v226_v43 = vpop.eup %225 }
 0x220   :  { %v169_v45 = vadd.f32 %v194_v41, %v160_v42  ;;  %v150_v46 = vmul.f32 %v226_v43, %v134_v25 }
 0x222   :  { %v183_v47 = vmul.f32 %v180_v44, %v169_v45  ;;  %v159_v48 = vmul.f32 %v193_v39, %v150_v46 }
 0x224   :  { %185 = vst.msk [vmem:[%s328_s7 + $0x8] sm:$0xff] %vm39_vm0, %v183_v47  ;;  %v168_v50 = vadd.f32 %v194_v41, %v159_v48 }
 0x226   :  { %v182_v51 = vmul.f32 %v175_v49, %v168_v50 }
 0x228   :  { %184 = vst.msk [vmem:[%s328_s7] sm:$0xff] %vm39_vm0, %v182_v51 }

// kernel: transformer_encoder_forward.8
= control target key start
LH: loop header
LB: loop body
LE: loop exit
PB: predicated region body
PF: predicated region fallthrough
CT: control target
= control target key end

     0   :  { %vm33_vm0 = vcmask 261120   ;;  %v396_v20 = vmov 0.0   ;;  %vm143_vm1 = vcmask 523264   ;;  %v397_v43 = vmov 0   ;;  %s521_s1 = inlined_call_operand.vmem [shape: f32[32,64], index: 1, kind: input, shape index: {}]   ;;  %s522_s0 = inlined_call_operand.vmem [shape: f32[16,32], index: 0, kind: input, shape index: {}]   ;;  %s523_s3 = inlined_call_operand.vmem [shape: f32[64,32], index: 3, kind: input, shape index: {}]   ;;  %s524_s2 = inlined_call_operand.vmem [shape: f32[1,64], index: 2, kind: input, shape index: {}]   ;;  %s525_s4 = inlined_call_operand.vmem [shape: f32[1,32], index: 4, kind: input, shape index: {}]   ;;  %s526_s7 = inlined_call_operand.vmem [shape: f32[16,1], index: 7, kind: input, shape index: {}]   ;;  %s527_s5 = inlined_call_operand.vmem [shape: f32[1,32], index: 5, kind: input, shape index: {}]   ;;  %s528_s6 = inlined_call_operand.vmem [shape: f32[1,32], index: 6, kind: input, shape index: {}]   ;;  %s529_s8 = inlined_call_operand.vmem [shape: f32[16,32], index: 8, kind: output, shape index: {}]  }
   0x1   :  { %v38_v0 = vld [vmem:[%s521_s1] sm:$0xff]  ;;  %v39_v1 = vld [vmem:[%s521_s1 + $0x8] sm:$0xff]  ;;  %v40_v2 = vld [vmem:[%s521_s1 + $0x10] sm:$0xff]  ;;  %35 = vst.msk [vmem:[#allocation2 + $0x8] sm:$0xff] %vm33_vm0, %v396_v20  ;;  %391 = vset.pattern.permute.xlu1 %v397_v43  ;;  %390 = vset.pattern.permute.xlu0 %v397_v43 }
   0x2   :  { %v364_v3 = vpack.c.bf16 %v39_v1, %v38_v0  ;;  %v41_v4 = vld [vmem:[%s521_s1 + $0x18] sm:$0xff]  ;;  %v36_v5 = vld [vmem:[%s522_s0] sm:$0xff]  ;;  %v136_v8 = vld [vmem:[%s523_s3 + $0x8] sm:$0xff]  ;;  %34 = vst.msk [vmem:[#allocation2] sm:$0xff] %vm33_vm0, %v396_v20 }
   0x3   :  { %v368_v6 = vpack.c.bf16 %v41_v4, %v40_v2  ;;  %342 = vmatprep.mubr.msk.f32.mxu0 %vm33_vm0, %v36_v5  ;;  %v135_v7 = vld [vmem:[%s523_s3] sm:$0xff]  ;;  %v137_v9 = vld [vmem:[%s523_s3 + $0x10] sm:$0xff]  ;;  %v138_v11 = vld [vmem:[%s523_s3 + $0x18] sm:$0xff] }
   0x4   :  { %365 = vmatprep.subr.bf16.mxu0 %v364_v3  ;;  %v372_v10 = vpack.c.bf16 %v136_v8, %v135_v7  ;;  %v376_v12 = vpack.c.bf16 %v138_v11, %v137_v9  ;;  %v139_v13 = vld [vmem:[%s523_s3 + $0x20] sm:$0xff]  ;;  %v140_v14 = vld [vmem:[%s523_s3 + $0x28] sm:$0xff]  ;;  %v141_v17 = vld [vmem:[%s523_s3 + $0x30] sm:$0xff] }
   0x5   :  { %367 = vmatpush3.bf16.msra.mxu0 %v364_v3  ;;  %v380_v15 = vpack.c.bf16 %v140_v14, %v139_v13  ;;  %v37_v16 = vld [vmem:[%s522_s0 + $0x8] sm:$0xff]  ;;  %v142_v18 = vld [vmem:[%s523_s3 + $0x38] sm:$0xff]  ;;  %v310_v21 = vld [vmem:[%s524_s2] ss:$0 sm:$0xff] }
   0x6   :  { %369 = vmatprep.subr.bf16.mxu0 %v368_v6  ;;  %373 = vmatprep.subr.bf16.mxu1 %v372_v10  ;;  %v384_v19 = vpack.c.bf16 %v142_v18, %v141_v17  ;;  %v315_v34 = vld [vmem:[%s525_s4] ss:$0 sm:$0xff]  ;;  %v291_v55 = vld [vmem:[%s526_s7 + $0x8] sm:$0xff] }
   0x7   :  { %375 = vmatpush3.bf16.msra.mxu1 %v372_v10  ;;  %v290_v44 = vld [vmem:[%s526_s7] sm:$0xff] }
   0x8   :  { %377 = vmatprep.subr.bf16.mxu1 %v376_v12  ;;  %v134_v28 = vld [vmem:[#allocation2 + $0x8] sm:$0xff]  ;;  %v316_v63 = vld [vmem:[%s527_s5] ss:$0 sm:$0xff] }
   0x9   :  { %371 = vmatpush3.bf16.msra.mxu0 %v368_v6  ;;  %v133_v29 = vld [vmem:[#allocation2] sm:$0xff] }
   0xa   :  { %v317_v1 = vld [vmem:[%s528_s6] ss:$0 sm:$0xff] }
   0xb   :  { %379 = vmatpush3.bf16.msra.mxu1 %v376_v12 }
   0xc   :  { %343 = vmatmul.mubr.msk.f32.vlgmr.msra.gmra.mrb[0].mxu0 %vm33_vm0, %v37_v16  ;;  %381 = vmatprep.subr.bf16.mxu1 %v380_v15 }
   0xf   :  { %383 = vmatpush3.bf16.msra.mxu1 %v380_v15 }
  0x10   :  { %385 = vmatprep.subr.bf16.mxu1 %v384_v19 }
  0x13   :  { %387 = vmatpush3.bf16.msra.mxu1 %v384_v19 }
  0xdf   :  { %v344_v22 = vpop.f32.mrb[0].mxu0 }
  0xe0   :  { %v128_v23 = vadd.f32 %v344_v22, %v310_v21  ;;  %v122_v24 = vpop.f32.mrb[1].mxu0 }
  0xe1   :  { %v123_v25 = vadd.f32 %v310_v21, %v122_v24 }
  0xe2   :  { %v132_v27 = vmax.f32 %v128_v23, 0.0 }
  0xe3   :  { %v131_v26 = vmax.f32 %v123_v25, 0.0 }
  0xe5   :  { %361 = vmatprep.mubr.msk.f32.mxu1 %vm143_vm1, %v131_v26 }
  0xe6   :  { %362 = vmatmul.mubr.msk.f32.vlgmr.msra.gmra.mrb[0].mxu1 %vm143_vm1, %v132_v27 }
 0x1b9   :  { %v363_v30 = vpop.f32.mrb[0].mxu1 }
 0x1ba   :  { %v226_v31 = vadd.f32 %v363_v30, %v134_v28  ;;  %v216_v32 = vpop.f32.mrb[1].mxu1 }
 0x1bb   :  { %v225_v33 = vadd.f32 %v216_v32, %v133_v29 }
 0x1bc   :  { %228 = vst.msk [vmem:[#allocation2 + $0x8] sm:$0xff] %vm33_vm0, %v226_v31 }
 0x1bd   :  { %227 = vst.msk [vmem:[#allocation2] sm:$0xff] %vm33_vm0, %v225_v33 }
 0x1c3   :  { %v233_v35 = vld [vmem:[#allocation2 + $0x8] sm:$0xff] }
 0x1c4   :  { %v232_v36 = vld [vmem:[#allocation2] sm:$0xff]  ;;  %v242_v38 = vadd.f32 %v315_v34, %v233_v35 }
 0x1c5   :  { %v241_v37 = vadd.f32 %v315_v34, %v232_v36 }
 0x1c6   :  { %v244_v41 = vadd.f32 %v242_v38, %v37_v16 }
 0x1c7   :  { %v243_v39 = vadd.f32 %v241_v37, %v36_v5 }
 0x1c8   :  { %v248_v42 = vsel %vm33_vm0, %v244_v41, 0.0 }
 0x1c9   :  { %v245_v40 = vsel %vm33_vm0, %v243_v39, 0.0 }
 0x1ca   :  { %246 = vadd.xlane.f32.xlu0 %v245_v40 }
 0x1ce   :  { %249 = vadd.xlane.f32.xlu0 %v248_v42 }
 0x1e4   :  { %294 = vperm.xlu0 %390, %v290_v44  }
 0x257   :  { %v247_v45 = vpop.xlane.xlu0 %246 }
 0x258   :  { %v252_v46 = vmul.f32 0.03125, %v247_v45 }
 0x25a   :  { %v254_v49 = vsub.f32 %v243_v39, %v252_v46 }
 0x25b   :  { %v250_v47 = vpop.xlane.xlu0 %249 }
 0x25c   :  { %v253_v48 = vmul.f32 0.03125, %v250_v47  ;;  %v256_v53 = vmul.f32 %v254_v49, %v254_v49 }
 0x25e   :  { %v255_v50 = vsub.f32 %v244_v41, %v253_v48  ;;  %v258_v54 = vsel %vm33_vm0, %v256_v53, 0.0 }
 0x260   :  { %v257_v51 = vmul.f32 %v255_v50, %v255_v50 }
 0x262   :  { %v261_v52 = vsel %vm33_vm0, %v257_v51, 0.0 }
 0x263   :  { %262 = vadd.xlane.f32.xlu1 %v261_v52  ;;  %v295_v9 = vpop.permute.xlu0 %294 }
 0x267   :  { %259 = vadd.xlane.f32.xlu1 %v258_v54 }
 0x278   :  { %299 = vperm.xlu1 %391, %v291_v55  }
 0x2f0   :  { %v263_v56 = vpop.xlane.xlu1 %262 }
 0x2f1   :  { %v265_v57 = vmul.f32 0.03125, %v263_v56 }
 0x2f3   :  { %v267_v58 = vadd.f32 1e-05, %v265_v57 }
 0x2f4   :  { %v260_v59 = vpop.xlane.xlu1 %259 }
 0x2f5   :  { %392 = vrsqrt.f32 %v267_v58  ;;  %v264_v60 = vmul.f32 0.03125, %v260_v59 }
 0x2f7   :  { %v266_v61 = vadd.f32 1e-05, %v264_v60 }
 0x2f8   :  { %v300_v4 = vpop.permute.xlu1 %299 }
 0x2f9   :  { %394 = vrsqrt.f32 %v266_v61 }
 0x2ff   :  { %v393_v62 = vpop.eup %392 }
 0x300   :  { %v271_v0 = vmul.f32 %v393_v62, %v255_v50 }
 0x302   :  { %v280_v2 = vmul.f32 %v316_v63, %v271_v0 }
 0x303   :  { %v395_v3 = vpop.eup %394 }
 0x304   :  { %v289_v5 = vadd.f32 %v317_v1, %v280_v2  ;;  %v270_v6 = vmul.f32 %v395_v3, %v254_v49 }
 0x306   :  { %v303_v7 = vmul.f32 %v300_v4, %v289_v5  ;;  %v279_v8 = vmul.f32 %v316_v63, %v270_v6 }
 0x308   :  { %305 = vst.msk [vmem:[%s529_s8 + $0x8] sm:$0xff] %vm33_vm0, %v303_v7  ;;  %v288_v10 = vadd.f32 %v317_v1, %v279_v8 }
 0x30a   :  { %v302_v11 = vmul.f32 %v295_v9, %v288_v10 }
 0x30c   :  { %304 = vst.msk [vmem:[%s529_s8] sm:$0xff] %vm33_vm0, %v302_v11 }

// kernel: transformer_encoder_forward.6
= control target key start
LH: loop header
LB: loop body
LE: loop exit
PB: predicated region body
PF: predicated region fallthrough
CT: control target
= control target key end

     0   :  { %s1341_s12 = smov 0   ;;  %s1343_s13 = smov 0   ;;  %s1465_s0 = inlined_call_operand.vmem [shape: f32[2,8,96], index: 0, kind: input, shape index: {}, may-alias: {0,1}]   ;;  %s1466_s1 = inlined_call_operand.vmem [shape: f32[2,8,96], index: 1, kind: input, shape index: {}, may-alias: {0,1}]   ;;  %s1467_s2 = inlined_call_operand.vmem [shape: f32[2,1,8], index: 2, kind: input, shape index: {}]   ;;  %s1468_s3 = inlined_call_operand.vmem [shape: f32[2,8,32], index: 3, kind: output, shape index: {}]  }
   0x1   :  { %s1345_s14 = smov 0  }
   0x2 LB: > { %s32_s15 = sadd.s32 1, %s1298_s13  ;;  %p1147_p0 = scmp.ge.s32.totalorder %s1302_s14, 1  ;;  %s1302_s14 = sphi %s1345_s14, %s13_s14   ;;  %s1298_s13 = sphi %s1343_s13, %s1470_s13   ;;  %s1294_s12 = sphi %s1341_s12, %s1469_s12  }
   0x3   : > { %p34_p1 = scmp.ge.s32.totalorder %s32_s15, 2  ;;  %p189_p2 = scmp.lt.s32.totalorder %s1302_s14, 3 }
   0x5   : > { %s1472_s15 = smov (%p34_p1, %s32_s15), 0  ;;  %p190_p3 = pnand %p1147_p0, %p189_p2 }
   0x6   : > { %p230_p4 = scmp.lt.s32.totalorder (!%p190_p3), %s1294_s12, 1  ;;  %vm261_vm0 = vcmask (!%p190_p3), 64512   ;;  %v1304_v0 = vmov (!%p190_p3), 0.0   ;;  %vm1305_vm1 = vmmov (!%p190_p3), 0   ;;  %s1306_s23 = smov (!%p190_p3), 96   ;;  %v1314_v6 = vmov (!%p190_p3), 0  }
   0x7   : > { %193 = sbr.rel (%p190_p3) target bundleno = 1013 (0x3f5), region = 32  ;;  %1181 = vmatprep.subr.mxu0 (!%p190_p3), %v1304_v0  ;;  %262 = vst.msk [vmem:[#allocation2] sm:$0xff] (!%p190_p3), %vm261_vm0, %v1304_v0  ;;  %263 = vst.msk [vmem:[#allocation2 + $0x8] sm:$0xff] (!%p190_p3), %vm261_vm0, %v1304_v0  ;;  %1183 = vmatprep.mubr.msk.f32.mxu0 (!%p190_p3), %vm1305_vm1, %v1304_v0  ;;  %s1307_s24 = smov (!%p190_p3), 88   ;;  %v358_v7 = vlaneseq (!%p190_p3)  ;;  %vm266_vm4 = vcmask (!%p190_p3), 7168   ;;  %vm1033_vm5 = vcmask (!%p190_p3), 130048  }
   0x8   : > { %264 = vst.msk [vmem:[#allocation2 + $0x10] sm:$0xff] (!%p190_p3), %vm261_vm0, %v1304_v0  ;;  %265 = vst.msk [vmem:[#allocation2 + $0x18] sm:$0xff] (!%p190_p3), %vm261_vm0, %v1304_v0  ;;  %1186 = vmatprep.subr.mxu1 (!%p190_p3), %v1304_v0  ;;  %1188 = vmatprep.mubr.msk.f32.mxu1 (!%p190_p3), %vm1305_vm1, %v1304_v0  ;;  %s1308_s25 = smov (!%p190_p3), 64   ;;  %s1309_s26 = smov (!%p190_p3), 120   ;;  %vm1035_vm6 = vcmask (!%p190_p3), 195584   ;;  %vm1037_vm7 = vcmask (!%p190_p3), 261120  }
   0x9   : > { %s1310_s27 = smov (!%p190_p3), 80   ;;  %s1311_s28 = smov (!%p190_p3), 112   ;;  %1262 = vset.pattern.permute.xlu0 (!%p190_p3), %v1314_v6  ;;  %1263 = vset.pattern.permute.xlu1 (!%p190_p3), %v1314_v6  ;;  %v359_v9 = vshrl.u32 (!%p190_p3), %v358_v7, 7  ;;  %268 = vst.msk [vmem:[#allocation3 + $0x8] sm:$0xff] (!%p190_p3), %vm266_vm4, %v1304_v0  ;;  %267 = vst.msk [vmem:[#allocation3] sm:$0xff] (!%p190_p3), %vm266_vm4, %v1304_v0 }
   0xa   : > { %s1312_s29 = smov (!%p190_p3), 72   ;;  %s1313_s30 = smov (!%p190_p3), 104   ;;  %269 = vst.msk [vmem:[#allocation3 + $0x10] sm:$0xff] (!%p190_p3), %vm266_vm4, %v1304_v0  ;;  %270 = vst.msk [vmem:[#allocation3 + $0x18] sm:$0xff] (!%p190_p3), %vm266_vm4, %v1304_v0 }
   0xb   : > { %s1315_s4 = smov (!%p190_p3), 56   ;;  %s1316_s5 = smov (!%p190_p3), 48   ;;  %v360_v13 = vsub.s32 (!%p190_p3), 0, %v359_v9 }
   0xc   : > { %s1317_s6 = smov (!%p190_p3), 40   ;;  %s1318_s10 = smov (!%p190_p3), 8  }
   0xd   : > { %s1319_s11 = smov (!%p190_p3), 16  }
   0xe   : > { %s1474_s12 = smov (!%p230_p4, %s1294_s12), 1  ;;  %v372_v25 = vld [vmem:[#allocation2] sm:$0xff] }
   0xf   : > { %s1376_s16 = sshll.u32 %s1474_s12, 3  ;;  %s249_s9 = scalar_lea.vmem %s1467_s2, %s1474_s12 }
  0x10   : > { %s243_s19 = scalar_lea.vmem %s1466_s1, %s1376_s16  ;;  %s236_s22 = scalar_lea.vmem %s1465_s0, %s1376_s16  ;;  %v271_v8 = vld [vmem:[%s249_s9] sm:$0x1]  ;;  %v539_v50 = vld [vmem:[#allocation3 + $0x8] sm:$0xff] }
  0x11   : > { %v274_v1 = vld [vmem:[%s243_s19] sm:$0xff]  ;;  %vm354_vm2 = vcmp.gt.f32.partialorder %v271_v8, 0.0  ;;  %v714_v53 = vld [vmem:[#allocation3 + $0x10] sm:$0xff]  ;;  %v889_v59 = vld [vmem:[#allocation3 + $0x18] sm:$0xff]  ;;  %s1320_s12 = smov 24   ;;  %s256_s19 = scalar_lea.vmem %s1468_s3, %s1376_s16 }
  0x12   : > { %v272_v2 = vld [vmem:[%s236_s22] sm:$0xff]  ;;  %276 = vrot.lane.b32.xlu0 %v274_v1, %s1306_s23  ;;  %459 = vrot.lane.b32.xlu1 %v274_v1, %s1307_s24  ;;  %v357_v14 = vsel %vm354_vm2, 1, %v1314_v6 }
  0x13   : > { %v273_v3 = vmul.f32 0.35355338, %v272_v2  ;;  %v1396_v16 = vrot.slane %v357_v14, %v360_v13  ;;  %v364_v54 = vld [vmem:[#allocation3] sm:$0xff]  ;;  %v722_v14 = vld [vmem:[#allocation2 + $0x10] sm:$0xff] }
  0x15   : > { %vm362_vm3 = vcmp.eq.s32.totalorder %v1396_v16, 1 }
  0x16   : > { %374 = vrot.lane.b32.xlu0 %v274_v1, %s1308_s25  ;;  %456 = vrot.lane.b32.xlu1 %v273_v3, %s1309_s26 }
  0x1a   : > { %634 = vrot.lane.b32.xlu0 %v274_v1, %s1310_s27  ;;  %631 = vrot.lane.b32.xlu1 %v273_v3, %s1311_s28 }
  0x1e   : > { %809 = vrot.lane.b32.xlu0 %v274_v1, %s1312_s29  ;;  %806 = vrot.lane.b32.xlu1 %v273_v3, %s1313_s30 }
  0x22   : > { %549 = vrot.lane.b32.xlu0 %v274_v1, %s1315_s4  ;;  %724 = vrot.lane.b32.xlu1 %v274_v1, %s1316_s5 }
  0x26   : > { %899 = vrot.lane.b32.xlu0 %v274_v1, %s1317_s6 }
  0x84   : > { %v277_v4 = vpop.permute.xlu0 %276  ;;  %v460_v15 = vpop.permute.xlu1 %459 }
  0x85   : > { %1182 = vmatpush3.xpose.msk.msra.mxu0 %vm261_vm0, %v277_v4 }
  0x86   : > { %1196 = vmatprep.subr.mxu0 %v1304_v0 }
  0x88   : > { %1184 = vmatmul.mubr.msk.f32.vlgmr.msra.gmra.mrb[0].mxu0 %vm261_vm0, %v273_v3  ;;  %v375_v5 = vpop.permute.xlu0 %374  ;;  %v457_v17 = vpop.permute.xlu1 %456 }
  0x89   : > { %1198 = vmatprep.mubr.msk.f32.mxu0 %vm1305_vm1, %v1304_v0  ;;  %1187 = vmatpush3.msra.mxu1 %v375_v5 }
  0x8a   : > { %1191 = vmatprep.subr.mxu1 %v1304_v0 }
  0x8c   : > { %v635_v20 = vpop.permute.xlu0 %634  ;;  %v632_v21 = vpop.permute.xlu1 %631 }
  0x90   : > { %v810_v22 = vpop.permute.xlu0 %809  ;;  %v807_v23 = vpop.permute.xlu1 %806 }
  0x94   : > { %v550_v24 = vpop.permute.xlu0 %549  ;;  %v725_v39 = vpop.permute.xlu1 %724 }
  0x95   : > { %1197 = vmatpush3.msra.mxu0 %v550_v24 }
  0x96   : > { %1206 = vmatprep.subr.mxu0 %v1304_v0 }
  0x98   : > { %v900_v44 = vpop.permute.xlu0 %899 }
 0x15b   : > { %v350_v10 = vpop.f32.mrb[0].mxu0 }
 0x15c   : > { %v355_v11 = vmul.f32 1.442695, %v350_v10  ;;  %v1185_v12 = vpop.f32.mrb[1].mxu0  ;;  %v547_v10 = vld [vmem:[#allocation2 + $0x8] sm:$0xff] }
 0x15e   : > { %1264 = vpow2.f32 %v355_v11 }
 0x168   : > { %v1265_v18 = vpop.eup %1264 }
 0x169   : > { %v363_v19 = vsel %vm362_vm3, %v1265_v18, 0.0  ;;  %v897_v18 = vld [vmem:[#allocation2 + $0x18] sm:$0xff] }
 0x16a   : > { %1189 = vmatmul.mubr.msk.f32.vlgmr.msra.gmra.mrb[0].mxu1 %vm261_vm0, %v363_v19  ;;  %v365_v46 = vsel %vm261_vm0, %v363_v19, 0.0 }
 0x16b   : > { %1192 = vmatpush3.xpose.msk.msra.mxu1 %vm261_vm0, %v460_v15  ;;  %1193 = vmatprep.mubr.msk.f32.mxu1 %vm1305_vm1, %v1304_v0 }
 0x16c   : > { %1201 = vmatprep.subr.mxu1 %v1304_v0 }
 0x16e   : > { %1194 = vmatmul.mubr.msk.f32.vlgmr.msra.gmra.mrb[2].mxu1 %vm261_vm0, %v457_v17 }
 0x16f   : > { %1202 = vmatpush3.xpose.msk.msra.mxu1 %vm261_vm0, %v635_v20  ;;  %1203 = vmatprep.mubr.msk.f32.mxu1 %vm1305_vm1, %v1304_v0 }
 0x170   : > { %1211 = vmatprep.subr.mxu1 %v1304_v0 }
 0x172   : > { %1204 = vmatmul.mubr.msk.f32.vlgmr.msra.gmra.mrb[4].mxu1 %vm261_vm0, %v632_v21 }
 0x173   : > { %1212 = vmatpush3.xpose.msk.msra.mxu1 %vm261_vm0, %v810_v22  ;;  %1213 = vmatprep.mubr.msk.f32.mxu1 %vm1305_vm1, %v1304_v0 }
 0x176   : > { %1214 = vmatmul.mubr.msk.f32.vlgmr.msra.gmra.mrb[6].mxu1 %vm261_vm0, %v807_v23 }
 0x23d   : > { %v446_v26 = vpop.f32.mrb[0].mxu1 }
 0x23e   : > { %v450_v27 = vadd.f32 %v446_v26, %v372_v25  ;;  %v1190_v28 = vpop.f32.mrb[1].mxu1 }
 0x240   : > { %451 = vst.msk [vmem:[#allocation2] sm:$0xff] %vm261_vm0, %v450_v27 }
 0x241   : > { %v531_v29 = vpop.f32.mrb[2].mxu1 }
 0x242   : > { %v535_v30 = vmul.f32 1.442695, %v531_v29  ;;  %v1195_v31 = vpop.f32.mrb[3].mxu1 }
 0x244   : > { %1266 = vpow2.f32 %v535_v30 }
 0x245   : > { %v706_v32 = vpop.f32.mrb[4].mxu1 }
 0x246   : > { %v710_v33 = vmul.f32 1.442695, %v706_v32  ;;  %v1205_v34 = vpop.f32.mrb[5].mxu1 }
 0x248   : > { %1268 = vpow2.f32 %v710_v33  ;;  %v983_v33 = vld [vmem:[#allocation2] sm:$0xff] }
 0x249   : > { %v881_v35 = vpop.f32.mrb[6].mxu1 }
 0x24a   : > { %v885_v36 = vmul.f32 1.442695, %v881_v35  ;;  %v1215_v37 = vpop.f32.mrb[7].mxu1 }
 0x24c   : > { %1270 = vpow2.f32 %v885_v36 }
 0x24e   : > { %v1267_v38 = vpop.eup %1266 }
 0x24f   : > { %v537_v40 = vsel %vm362_vm3, %v1267_v38, 0.0 }
 0x250   : > { %1199 = vmatmul.mubr.msk.f32.vlgmr.msra.gmra.mrb[2].mxu0 %vm261_vm0, %v537_v40  ;;  %v540_v41 = vsel %vm261_vm0, %v537_v40, 0.0 }
 0x251   : > { %541 = vadd.xlane.f32.xlu1 %v540_v41  ;;  %1207 = vmatpush3.msra.mxu0 %v725_v39 }
 0x252   : > { %v1269_v42 = vpop.eup %1268  ;;  %1208 = vmatprep.mubr.msk.f32.mxu0 %vm1305_vm1, %v1304_v0  ;;  %1216 = vmatprep.subr.mxu0 %v1304_v0 }
 0x253   : > { %v712_v43 = vsel %vm362_vm3, %v1269_v42, 0.0 }
 0x254   : > { %1209 = vmatmul.mubr.msk.f32.vlgmr.msra.gmra.mrb[4].mxu0 %vm261_vm0, %v712_v43  ;;  %v715_v45 = vsel %vm261_vm0, %v712_v43, 0.0 }
 0x255   : > { %716 = vadd.xlane.f32.xlu0 %v715_v45  ;;  %366 = vadd.xlane.f32.xlu1 %v365_v46 }
 0x256   : > { %v1271_v47 = vpop.eup %1270  ;;  %1217 = vmatpush3.msra.mxu0 %v900_v44  ;;  %1218 = vmatprep.mubr.msk.f32.mxu0 %vm1305_vm1, %v1304_v0 }
 0x257   : > { %v887_v48 = vsel %vm362_vm3, %v1271_v47, 0.0 }
 0x258   : > { %1219 = vmatmul.mubr.msk.f32.vlgmr.msra.gmra.mrb[6].mxu0 %vm261_vm0, %v887_v48  ;;  %v890_v49 = vsel %vm261_vm0, %v887_v48, 0.0 }
 0x259   : > { %891 = vadd.xlane.f32.xlu0 %v890_v49 }
 0x2de   : > { %v542_v51 = vpop.xlane.xlu1 %541 }
 0x2df   : > { %v543_v52 = vadd.f32 %v542_v51, %v539_v50 }
 0x2e1   : > { %544 = vst.msk [vmem:[#allocation3 + $0x8] sm:$0xff] %vm266_vm4, %v543_v52 }
 0x2e2   : > { %v717_v55 = vpop.xlane.xlu0 %716  ;;  %v367_v56 = vpop.xlane.xlu1 %366 }
 0x2e3   : > { %v718_v57 = vadd.f32 %v717_v55, %v714_v53  ;;  %v368_v58 = vadd.f32 %v367_v56, %v364_v54 }
 0x2e5   : > { %719 = vst.msk [vmem:[#allocation3 + $0x10] sm:$0xff] %vm266_vm4, %v718_v57  ;;  %370 = vst.msk [vmem:[#allocation3] sm:$0xff] %vm266_vm4, %v368_v58 }
 0x2e6   : > { %v892_v60 = vpop.xlane.xlu0 %891 }
 0x2e7   : > { %v893_v61 = vadd.f32 %v892_v60, %v889_v59 }
 0x2e8   : > { %v990_v62 = vld [vmem:[#allocation3 + $0x8] sm:$0xff] }
 0x2e9   : > { %894 = vst.msk [vmem:[#allocation3 + $0x18] sm:$0xff] %vm266_vm4, %v893_v61  ;;  %v991_v63 = vadd.f32 1e-10, %v990_v62 }
 0x2eb   : > { %1272 = vrcp.f32 %v991_v63 }
 0x2ec   : > { %v1000_v0 = vld [vmem:[#allocation3 + $0x10] sm:$0xff]  ;;  %v980_v3 = vld [vmem:[#allocation3] sm:$0xff] }
 0x2ed   : > { %v1001_v1 = vadd.f32 1e-10, %v1000_v0  ;;  %v981_v5 = vadd.f32 1e-10, %v980_v3 }
 0x2ef   : > { %1274 = vrcp.f32 %v1001_v1 }
 0x2f0   : > { %v1010_v2 = vld [vmem:[#allocation3 + $0x18] sm:$0xff] }
 0x2f1   : > { %v1011_v4 = vadd.f32 1e-10, %v1010_v2 }
 0x2f3   : > { %1276 = vrcp.f32 %v1011_v4 }
 0x2f4   : > { %1278 = vrcp.f32 %v981_v5 }
 0x2f5   : > { %v1273_v6 = vpop.eup %1272 }
 0x2f6   : > { %996 = vperm.xlu0 %1262, %v1273_v6  }
 0x2f9   : > { %v1275_v7 = vpop.eup %1274 }
 0x2fa   : > { %1006 = vperm.xlu1 %1263, %v1275_v7  }
 0x2fd   : > { %v1277_v8 = vpop.eup %1276 }
 0x2fe   : > { %1016 = vperm.xlu1 %1263, %v1277_v8   ;;  %v1279_v9 = vpop.eup %1278 }
 0x302   : > { %986 = vperm.xlu1 %1263, %v1279_v9  }
 0x323   : > { %v621_v11 = vpop.f32.mrb[2].mxu0 }
 0x324   : > { %v625_v12 = vadd.f32 %v621_v11, %v547_v10  ;;  %v1200_v13 = vpop.f32.mrb[3].mxu0 }
 0x326   : > { %626 = vst.msk [vmem:[#allocation2 + $0x8] sm:$0xff] %vm261_vm0, %v625_v12 }
 0x327   : > { %v796_v15 = vpop.f32.mrb[4].mxu0 }
 0x328   : > { %v800_v16 = vadd.f32 %v796_v15, %v722_v14  ;;  %v1210_v17 = vpop.f32.mrb[5].mxu0 }
 0x32a   : > { %801 = vst.msk [vmem:[#allocation2 + $0x10] sm:$0xff] %vm261_vm0, %v800_v16 }
 0x32b   : > { %v971_v19 = vpop.f32.mrb[6].mxu0 }
 0x32c   : > { %v975_v20 = vadd.f32 %v971_v19, %v897_v18  ;;  %v1220_v21 = vpop.f32.mrb[7].mxu0 }
 0x32d   : > { %v993_v23 = vld [vmem:[#allocation2 + $0x8] sm:$0xff] }
 0x32e   : > { %976 = vst.msk [vmem:[#allocation2 + $0x18] sm:$0xff] %vm261_vm0, %v975_v20 }
 0x331   : > { %v1003_v26 = vld [vmem:[#allocation2 + $0x10] sm:$0xff] }
 0x335   : > { %v1013_v29 = vld [vmem:[#allocation2 + $0x18] sm:$0xff] }
 0x375   : > { %v997_v22 = vpop.permute.xlu0 %996 }
 0x376   : > { %v999_v24 = vmul.f32 %v997_v22, %v993_v23 }
 0x378   : > { %1021 = vrot.lane.b32.xlu1 %v999_v24, %s1318_s10 }
 0x379   : > { %v1007_v25 = vpop.permute.xlu1 %1006 }
 0x37a   : > { %v1009_v27 = vmul.f32 %v1007_v25, %v1003_v26 }
 0x37c   : > { %1025 = vrot.lane.b32.xlu1 %v1009_v27, %s1319_s11 }
 0x37d   : > { %v1017_v28 = vpop.permute.xlu1 %1016 }
 0x37e   : > { %v1019_v30 = vmul.f32 %v1017_v28, %v1013_v29 }
 0x380   : > { %1029 = vrot.lane.b32.xlu1 %v1019_v30, %s1320_s12 }
 0x381   : > { %v987_v31 = vpop.permute.xlu1 %986 }
 0x382   : > { %v989_v35 = vmul.f32 %v987_v31, %v983_v33 }
 0x3ea   : > { %v1022_v32 = vpop.permute.xlu1 %1021 }
 0x3eb   : > { %v1032_v36 = vsel %vm261_vm0, %v989_v35, %v1022_v32 }
 0x3ee   : > { %v1026_v34 = vpop.permute.xlu1 %1025 }
 0x3ef   : > { %v1034_v37 = vsel %vm1033_vm5, %v1032_v36, %v1026_v34 }
 0x3f2   : > { %v1030_v38 = vpop.permute.xlu1 %1029 }
 0x3f3   : > { %v1036_v39 = vsel %vm1035_vm6, %v1034_v37, %v1030_v38 }
 0x3f4   : > { %1038 = vst.msk [vmem:[%s256_s19] sm:$0xff] %vm1037_vm7, %v1036_v39 }
 0x3f5 PF: > { %s13_s14 = sadd.s32 1, %s1302_s14   ;;  %s1469_s12 = smov %s1298_s13 }
 0x3f6   : > { %p10_p5 = scmp.ge.s32.totalorder %s13_s14, 4   ;;  %s1470_s13 = smov %s1472_s15 }
 0x3f8   :  { %12 = sbr.rel (!%p10_p5) target bundleno = 2 (0x2), region = 82 }

</bundles_post_ra>
